<compile_context>
chip_gen: v6e
topology: v6e:2x2x1
jax: 0.10.0
libtpu: 0.0.40
codegen_flags: <defaults>
</compile_context>

<pallas_src>
import jax
import jax.numpy as jnp
from jax import lax
from jax.experimental import pallas as pl
from jax.experimental.pallas import tpu as pltpu

EPSILON = 1e-06
CUTOFF_LOWER = 1e-12
CUTOFF_UPPER = 5.0
NUM_RBF = 50


def rye_elman_kernel(inv_in_ref, eq_in_ref, ec_ref, inv_hid_ref,
                     wl_ref, wr_ref, wi2i_ref, bi2i_ref, we2e_ref, wdamp_ref,
                     wr1_ref, br1_ref, wr2_ref, br2_ref, means_ref, betas_ref,
                     inv_out_ref, eq_out_ref):
    f32 = jnp.float32
    inv_in = inv_in_ref[0]      # (N, I)
    eq_in = eq_in_ref[0]        # (N, 3)
    ec = ec_ref[0]              # (3, N, 1+C)  -- combined equivariant tensor
    inv_hid = inv_hid_ref[0]    # (N, H)

    N, I = inv_in.shape
    H = inv_hid.shape[-1]
    C1 = ec.shape[-1]           # 1 + C
    C = C1 - 1
    NN = N * N

    def mm(a, b):
        return jnp.dot(a, b, preferred_element_type=f32)

    # --- DotProductProjection (equivariant -> invariant) ---------------------
    # Per-channel norm over the spatial axis (channel 0 is the raw eq_input).
    norm = ec[0] * ec[0] + ec[1] * ec[1] + ec[2] * ec[2] + EPSILON   # (N, 1+C)
    x_flat = (ec / norm[None, :, :]).reshape(3 * N, C1)             # (3N, 1+C)
    left = mm(x_flat, wl_ref[...])                                  # (3N, H)
    right = mm(x_flat, wr_ref[...])                                 # (3N, H)
    e2i = (left[0:N] * right[0:N]
           + left[N:2 * N] * right[N:2 * N]
           + left[2 * N:3 * N] * right[2 * N:3 * N])                # (N, H)

    # --- invariant -> invariant linear on cat([inv_in, inv_hid], -1) ---------
    wi2i = wi2i_ref[...]
    i2i = mm(inv_in, wi2i[:I, :]) + mm(inv_hid, wi2i[I:, :]) + bi2i_ref[...]

    # --- Smeared RBF path, batched over all N*N (i, j) pairs -----------------
    # Exact one-hot selectors (built from 3-D iota; reshape only merges leading
    # dims) turn the pair expansion into two small MXU matmuls.
    ii = lax.broadcasted_iota(jnp.int32, (N, N, N), 0)
    jj = lax.broadcasted_iota(jnp.int32, (N, N, N), 1)
    kk = lax.broadcasted_iota(jnp.int32, (N, N, N), 2)
    sel_i = (ii == kk).astype(f32).reshape(NN, N)        # row p = one-hot(i of p)
    sel_j = (jj == kk).astype(f32).reshape(NN, N)        # row p = one-hot(j of p)
    p_i = mm(sel_i, eq_in)                               # (NN, 3)
    p_j = mm(sel_j, eq_in)                               # (NN, 3)
    diff = p_i - p_j
    dist = jnp.sum(diff * diff, axis=-1, keepdims=True)  # (NN, 1)

    alpha = 5.0 / (CUTOFF_UPPER - CUTOFF_LOWER)
    t = jnp.exp(alpha * (CUTOFF_LOWER - dist))                         # (NN, 1)
    rb = jnp.exp(-betas_ref[...] * (t - means_ref[...]) ** 2)          # (NN, 50)
    h1 = mm(rb, wr1_ref[...]) + br1_ref[...]                           # (NN, H)
    h1 = h1 * jax.nn.sigmoid(h1)                                       # SiLU
    # Second layer is linear: sum over the neighbor axis first, matmul once.
    s = jnp.sum(h1.reshape(N, N, H), axis=1)                           # (N, H)
    rbf_out = mm(s, wr2_ref[...]) * (1.0 / N) + br2_ref[...]           # (N, H)

    inv_new = jnp.tanh(e2i + i2i + rbf_out)                            # (N, H)
    inv_out_ref[0] = inv_new.astype(inv_out_ref.dtype)

    # --- equivariant update ---------------------------------------------------
    wdamp = wdamp_ref[...]
    damp = mm(inv_in, wdamp[:I, :]) + mm(inv_hid, wdamp[I:, :])        # (N, C)
    ec_flat = ec.reshape(3 * N, C1)                                    # (3N, 1+C)
    e2e = mm(ec_flat, we2e_ref[...])                                   # (3N, C)
    hid_damp = (ec[:, :, 1:] * damp[None, :, :]).reshape(3 * N, C)     # (3N, C)
    eq_new = (e2e + hid_damp).reshape(3, N, C)                         # (3, N, C)
    eq_out_ref[0] = eq_new.astype(eq_out_ref.dtype)                    # single store


def rye_elman_pallas(params, inv_in, eq_in, inv_hid, eq_hid):
    B, N, I = inv_in.shape
    H = inv_hid.shape[-1]
    C = eq_hid.shape[-1]

    # Combined equivariant tensor in kernel layout (B, 3, N, 1+C): wrapper-side
    # concat/transpose is pure layout plumbing.
    ec = jnp.concatenate([eq_in[..., None], eq_hid], axis=-1)   # (B, N, 3, 1+C)
    ec_t = jnp.transpose(ec, (0, 2, 1, 3))                      # (B, 3, N, 1+C)

    def full(shape):
        return pl.BlockSpec(shape, lambda b, _s=shape: tuple(0 for _ in _s))

    in_specs = [
        pl.BlockSpec((1, N, I), lambda b: (b, 0, 0)),
        pl.BlockSpec((1, N, 3), lambda b: (b, 0, 0)),
        pl.BlockSpec((1, 3, N, 1 + C), lambda b: (b, 0, 0, 0)),
        pl.BlockSpec((1, N, H), lambda b: (b, 0, 0)),
        full((1 + C, H)), full((1 + C, H)),
        full((I + H, H)), full((1, H)),
        full((1 + C, C)), full((I + H, C)),
        full((NUM_RBF, H)), full((1, H)),
        full((H, H)), full((1, H)),
        full((1, NUM_RBF)), full((1, NUM_RBF)),
    ]
    out_specs = [
        pl.BlockSpec((1, N, H), lambda b: (b, 0, 0)),
        pl.BlockSpec((1, 3, N, C), lambda b: (b, 0, 0, 0)),
    ]
    out_shape = [
        jax.ShapeDtypeStruct((B, N, H), jnp.float32),
        jax.ShapeDtypeStruct((B, 3, N, C), jnp.float32),
    ]

    inv_out, eq_out_t = pl.pallas_call(
        rye_elman_kernel,
        out_shape=out_shape,
        grid_spec=pltpu.PrefetchScalarGridSpec(
            num_scalar_prefetch=0,
            grid=(B,),
            in_specs=in_specs,
            out_specs=out_specs,
        ),
        compiler_params=pltpu.CompilerParams(
            dimension_semantics=("parallel",)),   # B>=2 keeps both v7x TCs busy
    )(inv_in, eq_in, ec_t, inv_hid,
      params['wl'], params['wr'], params['wi2i'], params['bi2i'],
      params['we2e'], params['wdamp'], params['wr1'], params['br1'],
      params['wr2'], params['br2'], params['means'], params['betas'])

    eq_out = jnp.transpose(eq_out_t, (0, 2, 1, 3))   # back to PyTorch (B, N, 3, C)
    return inv_out, eq_out


def rye_elman_ref(params, inv_in, eq_in, inv_hid, eq_hid):
    """Pure-JAX reference mirroring the PyTorch forward."""
    ec = jnp.concatenate([eq_in[..., None], eq_hid], axis=-1)      # (B, N, 3, 1+C)
    ic = jnp.concatenate([inv_in, inv_hid], axis=-1)               # (B, N, I+H)
    norm = jnp.sum(ec ** 2, axis=-2, keepdims=True) + EPSILON
    x = ec / norm
    e2i = jnp.sum((x @ params['wl']) * (x @ params['wr']), axis=-2)
    i2i = ic @ params['wi2i'] + params['bi2i'][0]
    delta = eq_in[..., :, None, :] - eq_in[..., None, :, :]
    dist = jnp.sum(delta ** 2, axis=-1)[..., None]                 # (B, N, N, 1)
    alpha = 5.0 / (CUTOFF_UPPER - CUTOFF_LOWER)
    rb = jnp.exp(-params['betas'][0] *
                 (jnp.exp(alpha * (-dist + CUTOFF_LOWER)) - params['means'][0]) ** 2)
    h1 = rb @ params['wr1'] + params['br1'][0]
    h1 = h1 * jax.nn.sigmoid(h1)
    h2 = h1 @ params['wr2'] + params['br2'][0]
    rbf_out = jnp.mean(h2, axis=-2)
    inv_new = jnp.tanh(e2i + i2i + rbf_out)
    damp = (ic @ params['wdamp'])[..., None, :]
    eq_new = ec @ params['we2e'] + eq_hid * damp
    return inv_new, eq_new


def init_params(key, I, H, C):
    ks = jax.random.split(key, 10)
    s = 0.1
    p = {
        'wl':    jax.random.normal(ks[0], (1 + C, H), jnp.float32) * s,
        'wr':    jax.random.normal(ks[1], (1 + C, H), jnp.float32) * s,
        'wi2i':  jax.random.normal(ks[2], (I + H, H), jnp.float32) * s,
        'bi2i':  jax.random.normal(ks[3], (1, H), jnp.float32) * s,
        'we2e':  jax.random.normal(ks[4], (1 + C, C), jnp.float32) * s,
        'wdamp': jax.random.normal(ks[5], (I + H, C), jnp.float32) * s,
        'wr1':   jax.random.normal(ks[6], (NUM_RBF, H), jnp.float32) * s,
        'br1':   jax.random.normal(ks[7], (1, H), jnp.float32) * s,
        'wr2':   jax.random.normal(ks[8], (H, H), jnp.float32) * s,
        'br2':   jax.random.normal(ks[9], (1, H), jnp.float32) * s,
    }
    start = jnp.exp(jnp.float32(-CUTOFF_UPPER + CUTOFF_LOWER))
    p['means'] = jnp.linspace(start, 1.0, NUM_RBF, dtype=jnp.float32).reshape(1, NUM_RBF)
    p['betas'] = jnp.full((1, NUM_RBF),
                          ((2.0 / NUM_RBF) * (1.0 - start)) ** (-2),
                          dtype=jnp.float32)
    return p


if __name__ == "__main__":
    B, N, I, H, C = 2, 8, 16, 32, 4
    key = jax.random.PRNGKey(0)
    kp, k1, k2, k3, k4 = jax.random.split(key, 5)

    params = init_params(kp, I, H, C)
    inv_in = jax.random.normal(k1, (B, N, I), jnp.float32)
    eq_in = jax.random.normal(k2, (B, N, 3), jnp.float32)
    inv_hid = jax.random.normal(k3, (B, N, H), jnp.float32)
    eq_hid = jax.random.normal(k4, (B, N, 3, C), jnp.float32)

    inv_out, eq_out = jax.block_until_ready(
        rye_elman_pallas(params, inv_in, eq_in, inv_hid, eq_hid))

    inv_ref, eq_ref = rye_elman_ref(params, inv_in, eq_in, inv_hid, eq_hid)
    assert inv_out.shape == (B, N, H)
    assert eq_out.shape == (B, N, 3, C)
    assert jnp.allclose(inv_out, inv_ref, rtol=1e-4, atol=1e-4)
    assert jnp.allclose(eq_out, eq_ref, rtol=1e-4, atol=1e-4)
    print("KERNEL_OK")
</pallas_src>

<mosaic_0001>
module attributes {stable_mosaic.version = 11 : i64} {
  func.func @rye_elman_kernel(%arg0: i32, %arg1: memref<1x8x16xf32, #tpu.memory_space<vmem>>, %arg2: memref<1x8x3xf32, #tpu.memory_space<vmem>>, %arg3: memref<1x3x8x5xf32, #tpu.memory_space<vmem>>, %arg4: memref<1x8x32xf32, #tpu.memory_space<vmem>>, %arg5: memref<5x32xf32, #tpu.memory_space<vmem>>, %arg6: memref<5x32xf32, #tpu.memory_space<vmem>>, %arg7: memref<48x32xf32, #tpu.memory_space<vmem>>, %arg8: memref<1x32xf32, #tpu.memory_space<vmem>>, %arg9: memref<5x4xf32, #tpu.memory_space<vmem>>, %arg10: memref<48x4xf32, #tpu.memory_space<vmem>>, %arg11: memref<50x32xf32, #tpu.memory_space<vmem>>, %arg12: memref<1x32xf32, #tpu.memory_space<vmem>>, %arg13: memref<32x32xf32, #tpu.memory_space<vmem>>, %arg14: memref<1x32xf32, #tpu.memory_space<vmem>>, %arg15: memref<1x50xf32, #tpu.memory_space<vmem>>, %arg16: memref<1x50xf32, #tpu.memory_space<vmem>>, %arg17: memref<1x8x32xf32, #tpu.memory_space<vmem>>, %arg18: memref<1x3x8x4xf32, #tpu.memory_space<vmem>>) attributes {dimension_semantics = [#tpu.dimension_semantics<parallel>], iteration_bounds = array<i64: 2>, scalar_prefetch = 0 : i64, scratch_operands = 0 : i64, tpu.core_type = #tpu.core_type<tc>, window_params = [{transform_indices = @transform_0, window_bounds = array<i64: 1, 8, 16>}, {transform_indices = @transform_1, window_bounds = array<i64: 1, 8, 3>}, {transform_indices = @transform_2, window_bounds = array<i64: 1, 3, 8, 5>}, {transform_indices = @transform_3, window_bounds = array<i64: 1, 8, 32>}, {pipeline_mode = #tpu.pipeline_mode<synchronous>, transform_indices = @transform_4, window_bounds = array<i64: 5, 32>}, {pipeline_mode = #tpu.pipeline_mode<synchronous>, transform_indices = @transform_5, window_bounds = array<i64: 5, 32>}, {pipeline_mode = #tpu.pipeline_mode<synchronous>, transform_indices = @transform_6, window_bounds = array<i64: 48, 32>}, {pipeline_mode = #tpu.pipeline_mode<synchronous>, transform_indices = @transform_7, window_bounds = array<i64: 1, 32>}, {pipeline_mode = #tpu.pipeline_mode<synchronous>, transform_indices = @transform_8, window_bounds = array<i64: 5, 4>}, {pipeline_mode = #tpu.pipeline_mode<synchronous>, transform_indices = @transform_9, window_bounds = array<i64: 48, 4>}, {pipeline_mode = #tpu.pipeline_mode<synchronous>, transform_indices = @transform_10, window_bounds = array<i64: 50, 32>}, {pipeline_mode = #tpu.pipeline_mode<synchronous>, transform_indices = @transform_11, window_bounds = array<i64: 1, 32>}, {pipeline_mode = #tpu.pipeline_mode<synchronous>, transform_indices = @transform_12, window_bounds = array<i64: 32, 32>}, {pipeline_mode = #tpu.pipeline_mode<synchronous>, transform_indices = @transform_13, window_bounds = array<i64: 1, 32>}, {pipeline_mode = #tpu.pipeline_mode<synchronous>, transform_indices = @transform_14, window_bounds = array<i64: 1, 50>}, {pipeline_mode = #tpu.pipeline_mode<synchronous>, transform_indices = @transform_15, window_bounds = array<i64: 1, 50>}, {transform_indices = @transform_16, window_bounds = array<i64: 1, 8, 32>}, {transform_indices = @transform_17, window_bounds = array<i64: 1, 3, 8, 4>}]} {
    %c0 = arith.constant 0 : index
    %c0_0 = arith.constant 0 : index
    %c0_1 = arith.constant 0 : index
    %0 = vector.load %arg1[%c0, %c0_0, %c0_1] : memref<1x8x16xf32, #tpu.memory_space<vmem>>, vector<1x8x16xf32>
    %1 = vector.shape_cast %0 : vector<1x8x16xf32> to vector<8x16xf32>
    %c0_2 = arith.constant 0 : index
    %c0_3 = arith.constant 0 : index
    %c0_4 = arith.constant 0 : index
    %2 = vector.load %arg2[%c0_2, %c0_3, %c0_4] : memref<1x8x3xf32, #tpu.memory_space<vmem>>, vector<1x8x3xf32>
    %3 = vector.shape_cast %2 : vector<1x8x3xf32> to vector<8x3xf32>
    %c0_5 = arith.constant 0 : index
    %c0_6 = arith.constant 0 : index
    %c0_7 = arith.constant 0 : index
    %c0_8 = arith.constant 0 : index
    %4 = vector.load %arg3[%c0_5, %c0_6, %c0_7, %c0_8] : memref<1x3x8x5xf32, #tpu.memory_space<vmem>>, vector<1x3x8x5xf32>
    %5 = vector.shape_cast %4 : vector<1x3x8x5xf32> to vector<3x8x5xf32>
    %c0_9 = arith.constant 0 : index
    %c0_10 = arith.constant 0 : index
    %c0_11 = arith.constant 0 : index
    %6 = vector.load %arg4[%c0_9, %c0_10, %c0_11] : memref<1x8x32xf32, #tpu.memory_space<vmem>>, vector<1x8x32xf32>
    %7 = vector.shape_cast %6 : vector<1x8x32xf32> to vector<8x32xf32>
    %8 = vector.extract_strided_slice %5 {offsets = [0, 0, 0], sizes = [1, 8, 5], strides = [1, 1, 1]} : vector<3x8x5xf32> to vector<1x8x5xf32>
    %9 = vector.shape_cast %8 : vector<1x8x5xf32> to vector<8x5xf32>
    %10 = vector.extract_strided_slice %5 {offsets = [0, 0, 0], sizes = [1, 8, 5], strides = [1, 1, 1]} : vector<3x8x5xf32> to vector<1x8x5xf32>
    %11 = vector.shape_cast %10 : vector<1x8x5xf32> to vector<8x5xf32>
    %12 = arith.mulf %9, %11 : vector<8x5xf32>
    %13 = vector.extract_strided_slice %5 {offsets = [1, 0, 0], sizes = [1, 8, 5], strides = [1, 1, 1]} : vector<3x8x5xf32> to vector<1x8x5xf32>
    %14 = vector.shape_cast %13 : vector<1x8x5xf32> to vector<8x5xf32>
    %15 = vector.extract_strided_slice %5 {offsets = [1, 0, 0], sizes = [1, 8, 5], strides = [1, 1, 1]} : vector<3x8x5xf32> to vector<1x8x5xf32>
    %16 = vector.shape_cast %15 : vector<1x8x5xf32> to vector<8x5xf32>
    %17 = arith.mulf %14, %16 : vector<8x5xf32>
    %18 = arith.addf %12, %17 : vector<8x5xf32>
    %19 = vector.extract_strided_slice %5 {offsets = [2, 0, 0], sizes = [1, 8, 5], strides = [1, 1, 1]} : vector<3x8x5xf32> to vector<1x8x5xf32>
    %20 = vector.shape_cast %19 : vector<1x8x5xf32> to vector<8x5xf32>
    %21 = vector.extract_strided_slice %5 {offsets = [2, 0, 0], sizes = [1, 8, 5], strides = [1, 1, 1]} : vector<3x8x5xf32> to vector<1x8x5xf32>
    %22 = vector.shape_cast %21 : vector<1x8x5xf32> to vector<8x5xf32>
    %23 = arith.mulf %20, %22 : vector<8x5xf32>
    %24 = arith.addf %18, %23 : vector<8x5xf32>
    %cst = arith.constant 9.99999997E-7 : f32
    %25 = vector.broadcast %cst : f32 to vector<8x5xf32>
    %26 = arith.addf %24, %25 : vector<8x5xf32>
    %27 = vector.shape_cast %26 : vector<8x5xf32> to vector<1x8x5xf32>
    %28 = vector.broadcast %27 : vector<1x8x5xf32> to vector<3x8x5xf32>
    %29 = arith.divf %5, %28 : vector<3x8x5xf32>
    %30 = vector.shape_cast %29 : vector<3x8x5xf32> to vector<24x5xf32>
    %c0_12 = arith.constant 0 : index
    %c0_13 = arith.constant 0 : index
    %31 = vector.load %arg5[%c0_12, %c0_13] : memref<5x32xf32, #tpu.memory_space<vmem>>, vector<5x32xf32>
    %cst_14 = arith.constant dense<0.000000e+00> : vector<24x32xf32>
    %32 = tpu.matmul %30, %31, %cst_14 {dimension_numbers = #tpu.dot_dimension_numbers<[1], [0], [0], [1], [0, 0, 1, 1], [], []>} : vector<24x5xf32>, vector<5x32xf32>, vector<24x32xf32> -> vector<24x32xf32>
    %c0_15 = arith.constant 0 : index
    %c0_16 = arith.constant 0 : index
    %33 = vector.load %arg6[%c0_15, %c0_16] : memref<5x32xf32, #tpu.memory_space<vmem>>, vector<5x32xf32>
    %cst_17 = arith.constant dense<0.000000e+00> : vector<24x32xf32>
    %34 = tpu.matmul %30, %33, %cst_17 {dimension_numbers = #tpu.dot_dimension_numbers<[1], [0], [0], [1], [0, 0, 1, 1], [], []>} : vector<24x5xf32>, vector<5x32xf32>, vector<24x32xf32> -> vector<24x32xf32>
    %35 = vector.extract_strided_slice %32 {offsets = [0, 0], sizes = [8, 32], strides = [1, 1]} : vector<24x32xf32> to vector<8x32xf32>
    %36 = vector.extract_strided_slice %34 {offsets = [0, 0], sizes = [8, 32], strides = [1, 1]} : vector<24x32xf32> to vector<8x32xf32>
    %37 = arith.mulf %35, %36 : vector<8x32xf32>
    %38 = vector.extract_strided_slice %32 {offsets = [8, 0], sizes = [8, 32], strides = [1, 1]} : vector<24x32xf32> to vector<8x32xf32>
    %39 = vector.extract_strided_slice %34 {offsets = [8, 0], sizes = [8, 32], strides = [1, 1]} : vector<24x32xf32> to vector<8x32xf32>
    %40 = arith.mulf %38, %39 : vector<8x32xf32>
    %41 = arith.addf %37, %40 : vector<8x32xf32>
    %42 = vector.extract_strided_slice %32 {offsets = [16, 0], sizes = [8, 32], strides = [1, 1]} : vector<24x32xf32> to vector<8x32xf32>
    %43 = vector.extract_strided_slice %34 {offsets = [16, 0], sizes = [8, 32], strides = [1, 1]} : vector<24x32xf32> to vector<8x32xf32>
    %44 = arith.mulf %42, %43 : vector<8x32xf32>
    %45 = arith.addf %41, %44 : vector<8x32xf32>
    %c0_18 = arith.constant 0 : index
    %c0_19 = arith.constant 0 : index
    %46 = vector.load %arg7[%c0_18, %c0_19] : memref<48x32xf32, #tpu.memory_space<vmem>>, vector<48x32xf32>
    %47 = vector.extract_strided_slice %46 {offsets = [0, 0], sizes = [16, 32], strides = [1, 1]} : vector<48x32xf32> to vector<16x32xf32>
    %cst_20 = arith.constant dense<0.000000e+00> : vector<8x32xf32>
    %48 = tpu.matmul %1, %47, %cst_20 {dimension_numbers = #tpu.dot_dimension_numbers<[1], [0], [0], [1], [0, 0, 1, 1], [], []>} : vector<8x16xf32>, vector<16x32xf32>, vector<8x32xf32> -> vector<8x32xf32>
    %49 = vector.extract_strided_slice %46 {offsets = [16, 0], sizes = [32, 32], strides = [1, 1]} : vector<48x32xf32> to vector<32x32xf32>
    %cst_21 = arith.constant dense<0.000000e+00> : vector<8x32xf32>
    %50 = tpu.matmul %7, %49, %cst_21 {dimension_numbers = #tpu.dot_dimension_numbers<[1], [0], [0], [1], [0, 0, 1, 1], [], []>} : vector<8x32xf32>, vector<32x32xf32>, vector<8x32xf32> -> vector<8x32xf32>
    %51 = arith.addf %48, %50 : vector<8x32xf32>
    %c0_22 = arith.constant 0 : index
    %c0_23 = arith.constant 0 : index
    %52 = vector.load %arg8[%c0_22, %c0_23] : memref<1x32xf32, #tpu.memory_space<vmem>>, vector<1x32xf32>
    %53 = vector.broadcast %52 : vector<1x32xf32> to vector<8x32xf32>
    %54 = arith.addf %51, %53 : vector<8x32xf32>
    %55 = tpu.iota {dimensions = array<i32: 0>} : vector<8x8x8xi32>
    %56 = tpu.iota {dimensions = array<i32: 1>} : vector<8x8x8xi32>
    %57 = tpu.iota {dimensions = array<i32: 2>} : vector<8x8x8xi32>
    %58 = arith.cmpi eq, %55, %57 : vector<8x8x8xi32>
    %59 = arith.extui %58 : vector<8x8x8xi1> to vector<8x8x8xi32>
    %60 = arith.sitofp %59 : vector<8x8x8xi32> to vector<8x8x8xf32>
    %61 = vector.shape_cast %60 : vector<8x8x8xf32> to vector<64x8xf32>
    %62 = arith.cmpi eq, %56, %57 : vector<8x8x8xi32>
    %63 = arith.extui %62 : vector<8x8x8xi1> to vector<8x8x8xi32>
    %64 = arith.sitofp %63 : vector<8x8x8xi32> to vector<8x8x8xf32>
    %65 = vector.shape_cast %64 : vector<8x8x8xf32> to vector<64x8xf32>
    %cst_24 = arith.constant dense<0.000000e+00> : vector<64x3xf32>
    %66 = tpu.matmul %61, %3, %cst_24 {dimension_numbers = #tpu.dot_dimension_numbers<[1], [0], [0], [1], [0, 0, 1, 1], [], []>} : vector<64x8xf32>, vector<8x3xf32>, vector<64x3xf32> -> vector<64x3xf32>
    %cst_25 = arith.constant dense<0.000000e+00> : vector<64x3xf32>
    %67 = tpu.matmul %65, %3, %cst_25 {dimension_numbers = #tpu.dot_dimension_numbers<[1], [0], [0], [1], [0, 0, 1, 1], [], []>} : vector<64x8xf32>, vector<8x3xf32>, vector<64x3xf32> -> vector<64x3xf32>
    %68 = arith.subf %66, %67 : vector<64x3xf32>
    %69 = arith.mulf %68, %68 : vector<64x3xf32>
    %cst_26 = arith.constant dense<0.000000e+00> : vector<64xf32>
    %70 = vector.multi_reduction <add>, %69, %cst_26 [1] : vector<64x3xf32> to vector<64xf32>
    %71 = vector.shape_cast %70 : vector<64xf32> to vector<64x1xf32>
    %cst_27 = arith.constant 9.99999996E-13 : f32
    %72 = vector.broadcast %cst_27 : f32 to vector<64x1xf32>
    %73 = arith.subf %72, %71 : vector<64x1xf32>
    %cst_28 = arith.constant 1.000000e+00 : f32
    %74 = vector.broadcast %cst_28 : f32 to vector<64x1xf32>
    %75 = arith.mulf %74, %73 : vector<64x1xf32>
    %76 = math.exp %75 : vector<64x1xf32>
    %c0_29 = arith.constant 0 : index
    %c0_30 = arith.constant 0 : index
    %77 = vector.load %arg16[%c0_29, %c0_30] : memref<1x50xf32, #tpu.memory_space<vmem>>, vector<1x50xf32>
    %cst_31 = arith.constant 0.000000e+00 : f32
    %78 = vector.broadcast %cst_31 : f32 to vector<1x50xf32>
    %79 = arith.subf %78, %77 : vector<1x50xf32>
    %c0_32 = arith.constant 0 : index
    %c0_33 = arith.constant 0 : index
    %80 = vector.load %arg15[%c0_32, %c0_33] : memref<1x50xf32, #tpu.memory_space<vmem>>, vector<1x50xf32>
    %81 = vector.broadcast %76 : vector<64x1xf32> to vector<64x50xf32>
    %82 = vector.broadcast %80 : vector<1x50xf32> to vector<64x50xf32>
    %83 = arith.subf %81, %82 : vector<64x50xf32>
    %84 = arith.mulf %83, %83 : vector<64x50xf32>
    %85 = vector.broadcast %79 : vector<1x50xf32> to vector<64x50xf32>
    %86 = arith.mulf %85, %84 : vector<64x50xf32>
    %87 = math.exp %86 : vector<64x50xf32>
    %c0_34 = arith.constant 0 : index
    %c0_35 = arith.constant 0 : index
    %88 = vector.load %arg11[%c0_34, %c0_35] : memref<50x32xf32, #tpu.memory_space<vmem>>, vector<50x32xf32>
    %cst_36 = arith.constant dense<0.000000e+00> : vector<64x32xf32>
    %89 = tpu.matmul %87, %88, %cst_36 {dimension_numbers = #tpu.dot_dimension_numbers<[1], [0], [0], [1], [0, 0, 1, 1], [], []>} : vector<64x50xf32>, vector<50x32xf32>, vector<64x32xf32> -> vector<64x32xf32>
    %c0_37 = arith.constant 0 : index
    %c0_38 = arith.constant 0 : index
    %90 = vector.load %arg12[%c0_37, %c0_38] : memref<1x32xf32, #tpu.memory_space<vmem>>, vector<1x32xf32>
    %91 = vector.broadcast %90 : vector<1x32xf32> to vector<64x32xf32>
    %92 = arith.addf %89, %91 : vector<64x32xf32>
    %93 = arith.negf %92 : vector<64x32xf32>
    %94 = math.exp %93 : vector<64x32xf32>
    %cst_39 = arith.constant 1.000000e+00 : f32
    %95 = vector.broadcast %cst_39 : f32 to vector<64x32xf32>
    %96 = arith.addf %95, %94 : vector<64x32xf32>
    %97 = arith.divf %95, %96 : vector<64x32xf32>
    %98 = arith.mulf %92, %97 : vector<64x32xf32>
    %99 = vector.shape_cast %98 : vector<64x32xf32> to vector<8x8x32xf32>
    %cst_40 = arith.constant dense<0.000000e+00> : vector<8x32xf32>
    %100 = vector.multi_reduction <add>, %99, %cst_40 [1] : vector<8x8x32xf32> to vector<8x32xf32>
    %c0_41 = arith.constant 0 : index
    %c0_42 = arith.constant 0 : index
    %101 = vector.load %arg13[%c0_41, %c0_42] : memref<32x32xf32, #tpu.memory_space<vmem>>, vector<32x32xf32>
    %cst_43 = arith.constant dense<0.000000e+00> : vector<8x32xf32>
    %102 = tpu.matmul %100, %101, %cst_43 {dimension_numbers = #tpu.dot_dimension_numbers<[1], [0], [0], [1], [0, 0, 1, 1], [], []>} : vector<8x32xf32>, vector<32x32xf32>, vector<8x32xf32> -> vector<8x32xf32>
    %cst_44 = arith.constant 1.250000e-01 : f32
    %103 = vector.broadcast %cst_44 : f32 to vector<8x32xf32>
    %104 = arith.mulf %102, %103 : vector<8x32xf32>
    %c0_45 = arith.constant 0 : index
    %c0_46 = arith.constant 0 : index
    %105 = vector.load %arg14[%c0_45, %c0_46] : memref<1x32xf32, #tpu.memory_space<vmem>>, vector<1x32xf32>
    %106 = vector.broadcast %105 : vector<1x32xf32> to vector<8x32xf32>
    %107 = arith.addf %104, %106 : vector<8x32xf32>
    %108 = arith.addf %45, %54 : vector<8x32xf32>
    %109 = arith.addf %108, %107 : vector<8x32xf32>
    %110 = math.tanh %109 : vector<8x32xf32>
    %c0_47 = arith.constant 0 : index
    %c0_48 = arith.constant 0 : index
    %c0_49 = arith.constant 0 : index
    %111 = vector.load %arg17[%c0_47, %c0_48, %c0_49] : memref<1x8x32xf32, #tpu.memory_space<vmem>>, vector<1x8x32xf32>
    %112 = vector.shape_cast %111 : vector<1x8x32xf32> to vector<8x32xf32>
    %113 = vector.shape_cast %110 : vector<8x32xf32> to vector<1x8x32xf32>
    tpu.vector_store %arg17[%c0_47, %c0_48, %c0_49], %113 {strides = array<i32>} : memref<1x8x32xf32, #tpu.memory_space<vmem>>, vector<1x8x32xf32>,
    %c0_50 = arith.constant 0 : index
    %c0_51 = arith.constant 0 : index
    %114 = vector.load %arg10[%c0_50, %c0_51] : memref<48x4xf32, #tpu.memory_space<vmem>>, vector<48x4xf32>
    %115 = vector.extract_strided_slice %114 {offsets = [0, 0], sizes = [16, 4], strides = [1, 1]} : vector<48x4xf32> to vector<16x4xf32>
    %cst_52 = arith.constant dense<0.000000e+00> : vector<8x4xf32>
    %116 = tpu.matmul %1, %115, %cst_52 {dimension_numbers = #tpu.dot_dimension_numbers<[1], [0], [0], [1], [0, 0, 1, 1], [], []>} : vector<8x16xf32>, vector<16x4xf32>, vector<8x4xf32> -> vector<8x4xf32>
    %117 = vector.extract_strided_slice %114 {offsets = [16, 0], sizes = [32, 4], strides = [1, 1]} : vector<48x4xf32> to vector<32x4xf32>
    %cst_53 = arith.constant dense<0.000000e+00> : vector<8x4xf32>
    %118 = tpu.matmul %7, %117, %cst_53 {dimension_numbers = #tpu.dot_dimension_numbers<[1], [0], [0], [1], [0, 0, 1, 1], [], []>} : vector<8x32xf32>, vector<32x4xf32>, vector<8x4xf32> -> vector<8x4xf32>
    %119 = arith.addf %116, %118 : vector<8x4xf32>
    %120 = vector.shape_cast %5 : vector<3x8x5xf32> to vector<24x5xf32>
    %c0_54 = arith.constant 0 : index
    %c0_55 = arith.constant 0 : index
    %121 = vector.load %arg9[%c0_54, %c0_55] : memref<5x4xf32, #tpu.memory_space<vmem>>, vector<5x4xf32>
    %cst_56 = arith.constant dense<0.000000e+00> : vector<24x4xf32>
    %122 = tpu.matmul %120, %121, %cst_56 {dimension_numbers = #tpu.dot_dimension_numbers<[1], [0], [0], [1], [0, 0, 1, 1], [], []>} : vector<24x5xf32>, vector<5x4xf32>, vector<24x4xf32> -> vector<24x4xf32>
    %123 = vector.extract_strided_slice %5 {offsets = [0, 0, 1], sizes = [3, 8, 4], strides = [1, 1, 1]} : vector<3x8x5xf32> to vector<3x8x4xf32>
    %124 = vector.shape_cast %119 : vector<8x4xf32> to vector<1x8x4xf32>
    %125 = vector.broadcast %124 : vector<1x8x4xf32> to vector<3x8x4xf32>
    %126 = arith.mulf %123, %125 : vector<3x8x4xf32>
    %127 = vector.shape_cast %126 : vector<3x8x4xf32> to vector<24x4xf32>
    %128 = arith.addf %122, %127 : vector<24x4xf32>
    %129 = vector.shape_cast %128 : vector<24x4xf32> to vector<3x8x4xf32>
    %c0_57 = arith.constant 0 : index
    %c0_58 = arith.constant 0 : index
    %c0_59 = arith.constant 0 : index
    %c0_60 = arith.constant 0 : index
    %130 = vector.load %arg18[%c0_57, %c0_58, %c0_59, %c0_60] : memref<1x3x8x4xf32, #tpu.memory_space<vmem>>, vector<1x3x8x4xf32>
    %131 = vector.shape_cast %130 : vector<1x3x8x4xf32> to vector<3x8x4xf32>
    %132 = vector.shape_cast %129 : vector<3x8x4xf32> to vector<1x3x8x4xf32>
    tpu.vector_store %arg18[%c0_57, %c0_58, %c0_59, %c0_60], %132 {strides = array<i32>} : memref<1x3x8x4xf32, #tpu.memory_space<vmem>>, vector<1x3x8x4xf32>,
    return
  }
  func.func @transform_0(%arg0: i32) -> (i32, i32, i32) {
    %c0_i32 = arith.constant 0 : i32
    %c0_i32_0 = arith.constant 0 : i32
    %c0_i32_1 = arith.constant 0 : i32
    return %arg0, %c0_i32, %c0_i32_0 : i32, i32, i32
  }
  func.func @transform_1(%arg0: i32) -> (i32, i32, i32) {
    %c0_i32 = arith.constant 0 : i32
    %c0_i32_0 = arith.constant 0 : i32
    %c0_i32_1 = arith.constant 0 : i32
    return %arg0, %c0_i32, %c0_i32_0 : i32, i32, i32
  }
  func.func @transform_2(%arg0: i32) -> (i32, i32, i32, i32) {
    %c0_i32 = arith.constant 0 : i32
    %c0_i32_0 = arith.constant 0 : i32
    %c0_i32_1 = arith.constant 0 : i32
    %c0_i32_2 = arith.constant 0 : i32
    return %arg0, %c0_i32, %c0_i32_0, %c0_i32_1 : i32, i32, i32, i32
  }
  func.func @transform_3(%arg0: i32) -> (i32, i32, i32) {
    %c0_i32 = arith.constant 0 : i32
    %c0_i32_0 = arith.constant 0 : i32
    %c0_i32_1 = arith.constant 0 : i32
    return %arg0, %c0_i32, %c0_i32_0 : i32, i32, i32
  }
  func.func @transform_4(%arg0: i32) -> (i32, i32) {
    %c0_i32 = arith.constant 0 : i32
    %c0_i32_0 = arith.constant 0 : i32
    %c0_i32_1 = arith.constant 0 : i32
    return %c0_i32, %c0_i32_0 : i32, i32
  }
  func.func @transform_5(%arg0: i32) -> (i32, i32) {
    %c0_i32 = arith.constant 0 : i32
    %c0_i32_0 = arith.constant 0 : i32
    %c0_i32_1 = arith.constant 0 : i32
    return %c0_i32, %c0_i32_0 : i32, i32
  }
  func.func @transform_6(%arg0: i32) -> (i32, i32) {
    %c0_i32 = arith.constant 0 : i32
    %c0_i32_0 = arith.constant 0 : i32
    %c0_i32_1 = arith.constant 0 : i32
    return %c0_i32, %c0_i32_0 : i32, i32
  }
  func.func @transform_7(%arg0: i32) -> (i32, i32) {
    %c0_i32 = arith.constant 0 : i32
    %c0_i32_0 = arith.constant 0 : i32
    %c0_i32_1 = arith.constant 0 : i32
    return %c0_i32, %c0_i32_0 : i32, i32
  }
  func.func @transform_8(%arg0: i32) -> (i32, i32) {
    %c0_i32 = arith.constant 0 : i32
    %c0_i32_0 = arith.constant 0 : i32
    %c0_i32_1 = arith.constant 0 : i32
    return %c0_i32, %c0_i32_0 : i32, i32
  }
  func.func @transform_9(%arg0: i32) -> (i32, i32) {
    %c0_i32 = arith.constant 0 : i32
    %c0_i32_0 = arith.constant 0 : i32
    %c0_i32_1 = arith.constant 0 : i32
    return %c0_i32, %c0_i32_0 : i32, i32
  }
  func.func @transform_10(%arg0: i32) -> (i32, i32) {
    %c0_i32 = arith.constant 0 : i32
    %c0_i32_0 = arith.constant 0 : i32
    %c0_i32_1 = arith.constant 0 : i32
    return %c0_i32, %c0_i32_0 : i32, i32
  }
  func.func @transform_11(%arg0: i32) -> (i32, i32) {
    %c0_i32 = arith.constant 0 : i32
    %c0_i32_0 = arith.constant 0 : i32
    %c0_i32_1 = arith.constant 0 : i32
    return %c0_i32, %c0_i32_0 : i32, i32
  }
  func.func @transform_12(%arg0: i32) -> (i32, i32) {
    %c0_i32 = arith.constant 0 : i32
    %c0_i32_0 = arith.constant 0 : i32
    %c0_i32_1 = arith.constant 0 : i32
    return %c0_i32, %c0_i32_0 : i32, i32
  }
  func.func @transform_13(%arg0: i32) -> (i32, i32) {
    %c0_i32 = arith.constant 0 : i32
    %c0_i32_0 = arith.constant 0 : i32
    %c0_i32_1 = arith.constant 0 : i32
    return %c0_i32, %c0_i32_0 : i32, i32
  }
  func.func @transform_14(%arg0: i32) -> (i32, i32) {
    %c0_i32 = arith.constant 0 : i32
    %c0_i32_0 = arith.constant 0 : i32
    %c0_i32_1 = arith.constant 0 : i32
    return %c0_i32, %c0_i32_0 : i32, i32
  }
  func.func @transform_15(%arg0: i32) -> (i32, i32) {
    %c0_i32 = arith.constant 0 : i32
    %c0_i32_0 = arith.constant 0 : i32
    %c0_i32_1 = arith.constant 0 : i32
    return %c0_i32, %c0_i32_0 : i32, i32
  }
  func.func @transform_16(%arg0: i32) -> (i32, i32, i32) {
    %c0_i32 = arith.constant 0 : i32
    %c0_i32_0 = arith.constant 0 : i32
    %c0_i32_1 = arith.constant 0 : i32
    return %arg0, %c0_i32, %c0_i32_0 : i32, i32, i32
  }
  func.func @transform_17(%arg0: i32) -> (i32, i32, i32, i32) {
    %c0_i32 = arith.constant 0 : i32
    %c0_i32_0 = arith.constant 0 : i32
    %c0_i32_1 = arith.constant 0 : i32
    %c0_i32_2 = arith.constant 0 : i32
    return %arg0, %c0_i32, %c0_i32_0, %c0_i32_1 : i32, i32, i32, i32
  }
}

</mosaic_0001>

<bundles_post_ra>
// kernel: tpu_custom_call.1
= control target key start
LH: loop header
LB: loop body
LE: loop exit
PB: predicated region body
PF: predicated region fallthrough
CT: control target
= control target key end

     0   :  { %s3075_s0 = inlined_call_operand.vmem [shape: f32[2,8,16], index: 0, kind: input, shape index: {}]   ;;  %s3076_s1 = inlined_call_operand.vmem [shape: f32[2,8,3], index: 1, kind: input, shape index: {}]   ;;  %s3077_s2 = inlined_call_operand.vmem [shape: f32[2,3,8,5], index: 2, kind: input, shape index: {}]   ;;  %s3078_s3 = inlined_call_operand.vmem [shape: f32[2,8,32], index: 3, kind: input, shape index: {}]   ;;  %s3079_s4 = inlined_call_operand.vmem [shape: f32[5,32], index: 4, kind: input, shape index: {}]   ;;  %s3080_s5 = inlined_call_operand.vmem [shape: f32[5,32], index: 5, kind: input, shape index: {}]   ;;  %s3081_s6 = inlined_call_operand.vmem [shape: f32[48,32], index: 6, kind: input, shape index: {}]   ;;  %s3082_s7 = inlined_call_operand.vmem [shape: f32[1,32], index: 7, kind: input, shape index: {}]   ;;  %s3083_s8 = inlined_call_operand.vmem [shape: f32[5,4], index: 8, kind: input, shape index: {}]   ;;  %s3084_s9 = inlined_call_operand.vmem [shape: f32[48,4], index: 9, kind: input, shape index: {}]   ;;  %s3085_s10 = inlined_call_operand.vmem [shape: f32[50,32], index: 10, kind: input, shape index: {}]   ;;  %s3086_s11 = inlined_call_operand.vmem [shape: f32[1,32], index: 11, kind: input, shape index: {}]   ;;  %s3087_s12 = inlined_call_operand.vmem [shape: f32[32,32], index: 12, kind: input, shape index: {}]   ;;  %s3088_s13 = inlined_call_operand.vmem [shape: f32[1,32], index: 13, kind: input, shape index: {}]   ;;  %s3089_s14 = inlined_call_operand.vmem [shape: f32[1,50], index: 14, kind: input, shape index: {}]   ;;  %s3090_s15 = inlined_call_operand.vmem [shape: f32[1,50], index: 15, kind: input, shape index: {}]   ;;  %s3091_s16 = inlined_call_operand.hbm [shape: f32[2,8,32], index: 16, kind: output, shape index: {0}]   ;;  %s3092_s17 = inlined_call_operand.vmem [shape: f32[2,3,8,4], index: 17, kind: output, shape index: {1}]  }
   0x1   :  { %3098 = sst [smem:[#allocation9_spill]] %s3075_s0 }
   0x2   :  { %3099 = sst [smem:[#allocation10_spill]] %s3076_s1 }
   0x3   :  { %3100 = sst [smem:[#allocation11_spill]] %s3077_s2 }
   0x4   :  { %3101 = sst [smem:[#allocation12_spill]] %s3079_s4 }
   0x5   :  { %3102 = sst [smem:[#allocation13_spill]] %s3080_s5 }
   0x6   :  { %23 = vsyncpa [#allocation3], 0 }
   0x7   :  { %25 = vsyncpa [#allocation3 + $0x1], 0  ;;  %s2688_s24 = smov 0   ;;  %s2690_s25 = smov 0  }
   0x8   :  { %s2692_s26 = smov 0   ;;  %s2694_s27 = smov 0  }
   0x9 LB: > { %3103 = sst [smem:[#allocation5_spill]] %s2587_s26  ;;  %s2709_s28 = sadd.s32 4294967295, %s2591_s27   ;;  %s2591_s27 = sphi %s2694_s27, %s3116_s27   ;;  %s2587_s26 = sphi %s2692_s26, %s3121_s26   ;;  %s2583_s25 = sphi %s2690_s25, %s3120_s25   ;;  %s2579_s24 = sphi %s2688_s24, %s3119_s24  }
   0xa   : > { %s2137_s29 = sadd.s32 4294967294, %s2591_s27   ;;  %s2713_s0 = sadd.s32 1, %s2591_s27  }
   0xb   : > { %3104 = sst [smem:[#allocation6_spill]] %s2713_s0  ;;  %s394_s30 = sadd.s32 1, %s2587_s26 }
   0xc   : > { %s391_s18 = ssub.s32 %s2591_s27, %s2713_s0  ;;  %p404_p0 = scmp.ne.s32.totalorder %s2587_s26, %s2583_s25 }
   0xd   : > { %p392_p1 = scmp.eq.s32.totalorder %s391_s18, 0  ;;  %p405_p2 = scmp.eq.s32.totalorder %s2709_s28, 1 }
   0xe   : > { %p410_p3 = scmp.ne.s32.totalorder %s2583_s25, %s2579_s24  ;;  %p411_p4 = scmp.eq.s32.totalorder %s2137_s29, 1 }
   0xf   : > { %s2724_s19 = scalar_select %p392_p1, %s2587_s26, %s394_s30  }
  0x10   : > { %p2726_p5 = por %p405_p2, %p404_p0  ;;  %p2730_p6 = por %p411_p4, %p410_p3 }
  0x11   : > { %3105 = sst [smem:[#allocation7_spill]] %s2724_s19  ;;  %p2140_p7 = scmp.ge.s32.totalorder %s2591_s27, 1 }
  0x12   : > { %s3107_s20 = scalar_select %p2730_p6, 1, 0 }
  0x13   : > { %p520_p8 = scmp.lt.s32.totalorder %s2591_s27, 3 }
  0x14   : > { %3108 = sst [smem:[#allocation8_spill]] %s3107_s20 }
  0x15   : > { %p521_p9 = pnand %p2140_p7, %p520_p8 }
  0x16   : > { %s3109_s4 = sld [smem:[#allocation12_spill]] (!%p521_p9)  ;;  %p589_p10 = scmp.lt.s32.totalorder (!%p521_p9), %s2709_s28, 1 }
  0x17   : > { %524 = sbr.rel (%p521_p9) target bundleno = 1180 (0x49c), region = 84  ;;  %s3110_s2 = sld [smem:[#allocation11_spill]] (!%p521_p9) }
  0x18   : > { %s3111_s5 = sld [smem:[#allocation13_spill]] (!%p521_p9)  ;;  %s2595_s18 = smov (!%p521_p9), 1  }
  0x19   : > { %s3112_s26 = sld [smem:[#allocation10_spill]] (!%p521_p9)  ;;  %s2211_s22 = sshll.u32 (!%p521_p9), %s2709_s28, 7 }
  0x1a   : > { %s3113_s30 = sld [smem:[#allocation9_spill]] (!%p521_p9) }
  0x1c   : > { %v627_v0 = vld [vmem:[%s3109_s4] sm:$0x1f]  ;;  %vm638_vm0 = vcmask 1044480   ;;  %v2593_v1 = vmov 0.0   ;;  %vm2594_vm1 = vmmov 0   ;;  %s2745_s23 = scalar_select %p589_p10, %s2709_s28, 1  ;;  %v973_v17 = vlaneseq }
  0x1d   : > { %2414 = vmatprep.subr.mxu1 %v2593_v1  ;;  %2288 = vmatprep.mubr.msk.f32.mxu1 %vm2594_vm1, %v2593_v1  ;;  %vm628_vm2 = vcmask 39936   ;;  %v816_v15 = vld [vmem:[%s3081_s6 + $0x28] sm:$0xff]  ;;  %v815_v19 = vld [vmem:[%s3081_s6 + $0x20] sm:$0xff]  ;;  %v814_v22 = vld [vmem:[%s3081_s6 + $0x18] sm:$0xff]  ;;  %vm817_vm4 = vcmask 261120   ;;  %vm1004_vm6 = vcmask 64512  }
  0x1e   : > { %2415 = vmatpush3.msk.msra.mxu1 %vm638_vm0, %v627_v0  ;;  %2280 = vmatprep.subr.mxu0 %v2593_v1  ;;  %s3093_s29 = smul.u32 24, %s2745_s23  ;;  %v722_v13 = vld [vmem:[%s3111_s5] sm:$0x1f]  ;;  %v812_v18 = vld [vmem:[%s3081_s6 + $0x8] sm:$0xff]  ;;  %v2807_v21 = vand.u32 127, %v973_v17  ;;  %v2824_v23 = vshrl.u32 %v973_v17, 7 }
  0x1f   : > { %2291 = vmatprep.subr.mxu1 %v2593_v1  ;;  %2281 = vmatpush3.msk.msra.mxu0 %vm638_vm0, %v627_v0  ;;  %v811_v20 = vld [vmem:[%s3081_s6] sm:$0xff]  ;;  %v813_v24 = vld [vmem:[%s3081_s6 + $0x10] sm:$0xff]  ;;  %vm891_vm9 = vcmask 130048   ;;  %vm1258_vm15 = vcmask 23552  }
  0x20   : > { %2282 = vmatprep.mubr.msk.f32.mxu0 %vm2594_vm1, %v2593_v1  ;;  %2302 = vmatprep.subr.mxu0 %v2593_v1  ;;  %s2759_s21 = scalar_lea.vmem %s3110_s2, %s3093_s29  ;;  %s2797_s29 = sshll.u32 %s2745_s23, 3  ;;  %vm977_vm3 = vcmp.eq.s32.totalorder %v2807_v21, 0  ;;  %vm978_vm5 = vcmp.eq.s32.totalorder %v2807_v21, 1  ;;  %vm1001_vm7 = vcmp.eq.s32.totalorder %v2824_v23, %v2807_v21  ;;  %vm979_vm8 = vcmp.eq.s32.totalorder %v2807_v21, 2  ;;  %v2157_v57 = vld [vmem:[%s3082_s7] ss:$0 sm:$0xff] }
  0x21   : > { %v2762_v2 = vld [vmem:[%s2759_s21] sm:$0xff]  ;;  %v2765_v3 = vld [vmem:[%s2759_s21 + $0x8] sm:$0xff]  ;;  %v2768_v4 = vld [vmem:[%s2759_s21 + $0x10] sm:$0xff]  ;;  %s605_s4 = scalar_lea.vmem %s3078_s3, %s2797_s29  ;;  %s596_s0 = scalar_lea.vmem %s3112_s26, %s2797_s29  ;;  %v2158_v27 = vsel %vm977_vm3, 1.0, %v2593_v1  ;;  %v2159_v29 = vsel %vm978_vm5, 1.0, %v2593_v1  ;;  %v2166_v30 = vsel %vm1001_vm7, 1.0, %v2593_v1 }
  0x22   : > { %v617_v5 = vmul.f32 %v2762_v2, %v2762_v2  ;;  %v618_v6 = vmul.f32 %v2765_v3, %v2765_v3  ;;  %v620_v7 = vmul.f32 %v2768_v4, %v2768_v4  ;;  %v2834_v25 = vld [vmem:[%s605_s4] sm:$0xff]  ;;  %s592_s2 = scalar_lea.vmem %s3113_s30, %s2797_s29  ;;  %vm980_vm10 = vcmp.eq.s32.totalorder %v2807_v21, 3  ;;  %s579_s29 = sand.u32 1, %s2583_s25  }
  0x23   : > { %v612_v26 = vld [vmem:[%s596_s0] sm:$0xff]  ;;  %v2160_v31 = vsel %vm979_vm8, 1.0, %v2593_v1  ;;  %vm981_vm11 = vcmp.eq.s32.totalorder %v2807_v21, 4  ;;  %v2161_v32 = vsel %vm980_vm10, 1.0, %v2593_v1  ;;  %vm982_vm12 = vcmp.eq.s32.totalorder %v2807_v21, 5  ;;  %s2141_s4 = sshll.u32 %s579_s29, 3 }
  0x24   : > { %v619_v8 = vadd.f32 %v618_v6, %v617_v5  ;;  %v2853_v28 = vld [vmem:[%s592_s2] sm:$0xff]  ;;  %v2162_v33 = vsel %vm981_vm11, 1.0, %v2593_v1  ;;  %vm983_vm13 = vcmp.eq.s32.totalorder %v2807_v21, 6  ;;  %v2163_v34 = vsel %vm982_vm12, 1.0, %v2593_v1  ;;  %s581_s5 = scalar_lea.vmem [#allocation2], %s2141_s4  ;;  %s3032_s2 = scalar_lea.hbm %s3091_s16, %s2211_s22 }
  0x25   : > { %v2164_v35 = vsel %vm983_vm13, 1.0, %v2593_v1  ;;  %vm984_vm14 = vcmp.eq.s32.totalorder %v2807_v21, 7  ;;  %vm1401_vm3 = vcmask 1041408   ;;  %vm1376_vm5 = vcmask 408576   ;;  %s2014_s26 = sshll.u32 %s581_s5, 4  ;;  %s1996_s0 = scalar_lea.sflag [#allocation3], %s579_s29  ;;  %s2015_s26 = int_to_ptr.vmem [resolvable:$true] %s2014_s26 }
  0x26   : > { %v621_v9 = vadd.f32 %v620_v7, %v619_v8  ;;  %v2165_v36 = vsel %vm984_vm14, 1.0, %v2593_v1  ;;  %vm1636_vm7 = vcmask 1042434   ;;  %vm1638_vm8 = vcmask 1043459   ;;  %s2531_s20 = scalar_lea.vmem %s2015_s26, 128 }
  0x27   : > { %vm1640_vm10 = vcmask 1044484   ;;  %vm1642_vm11 = vcmask 1045509   ;;  %vm1644_vm12 = vcmask 1046534   ;;  %vm1646_vm13 = vcmask 1047559   ;;  %p2532_p11 = scmp.ne.s32.totalorder %s2015_s26, %s2531_s20 }
  0x28   : > { %v622_v10 = vadd.f32 1e-06, %v621_v9 }
  0x29   : > { %p2533_p12 = pnand %p2532_p11, %p2726_p5 }
  0x2a   : > { %2460 = vrcp.f32 %v622_v10 }
  0x2b   : > { %p2534_p13 = pneg %p2533_p12 }
  0x37   : > { %v2461_v11 = vpop.eup %2460 }
  0x38   : > { %v626_v12 = vmul.f32 %v2461_v11, %v2768_v4  ;;  %v624_v14 = vmul.f32 %v2461_v11, %v2762_v2  ;;  %v625_v16 = vmul.f32 %v2461_v11, %v2765_v3 }
  0x3a   : > { %2289 = vmatmul.mubr.msk.f32.vlgmr.msra.gmra.mxu1 %vm628_vm2, %v626_v12  ;;  %2283 = vmatmul.mubr.msk.f32.vlgmr.msra.gmra.mxu0 %vm628_vm2, %v624_v14 }
  0x3b   : > { %2292 = vmatpush3.msk.msra.mxu1 %vm638_vm0, %v722_v13  ;;  %2293 = vmatprep.mubr.msk.f32.mxu1 %vm2594_vm1, %v2593_v1 }
  0x3c   : > { %2313 = vmatprep.subr.mxu1 %v2593_v1  ;;  %2285 = vmatprep.mubr.msk.f32.mxu0 %vm2594_vm1, %v2593_v1 }
  0x3d   : > { %2303 = vmatpush3.msra.mxu0 %v816_v15 }
  0x3e   : > { %2294 = vmatmul.mubr.msk.f32.vlgmr.msra.gmra.mxu1 %vm628_vm2, %v624_v14  ;;  %2286 = vmatmul.mubr.msk.f32.gmra.mxu0 %vm628_vm2, %v625_v16 }
  0x3f   : > { %2314 = vmatpush3.msra.mxu1 %v812_v18  ;;  %2296 = vmatprep.mubr.msk.f32.mxu1 %vm2594_vm1, %v2593_v1 }
  0x40   : > { %2304 = vmatprep.subr.mxu0 %v2593_v1  ;;  %2315 = vmatprep.subr.mxu1 %v2593_v1 }
  0x41   : > { %2305 = vmatpush3.msra.mxu0 %v815_v19  ;;  %2316 = vmatpush3.msra.mxu1 %v811_v20 }
  0x42   : > { %2297 = vmatmul.mubr.msk.f32.gmra.mxu1 %vm628_vm2, %v625_v16  ;;  %2306 = vmatprep.subr.mxu0 %v2593_v1 }
  0x43   : > { %2299 = vmatprep.mubr.msk.f32.mxu1 %vm2594_vm1, %v2593_v1  ;;  %2307 = vmatpush3.msra.mxu0 %v814_v22 }
  0x44   : > { %2308 = vmatprep.subr.mxu0 %v2593_v1  ;;  %2310 = vmatprep.mubr.msk.f32.mxu0 %vm2594_vm1, %v2593_v1 }
  0x45   : > { %2309 = vmatpush3.msra.mxu0 %v813_v24  ;;  %2334 = vmatprep.subr.mxu1 %v612_v26 }
  0x46   : > { %2300 = vmatmul.mubr.msk.f32.gmra.mxu1 %vm628_vm2, %v626_v12  ;;  %2311 = vmatmul.mubr.msk.f32.vlgmr.msra.gmra.mxu0 %vm817_vm4, %v2834_v25 }
  0x47   : > { %2317 = vmatprep.mubr.msk.f32.mxu1 %vm2594_vm1, %v2593_v1  ;;  %2320 = vmatprep.subr.mxu0 %v612_v26 }
  0x48   : > { %2321 = vmatpush3.msra.mxu0 %v612_v26  ;;  %2322 = vmatprep.mubr.msk.f32.mxu0 %vm1004_vm6, %v2158_v27 }
  0x4a   : > { %2318 = vmatmul.mubr.msk.f32.vlgmr.msra.gmra.mxu1 %vm891_vm9, %v2853_v28  ;;  %2323 = vmatmul.mubr.msk.f32.vlgmr.msra.gmra.mxu0 %vm1004_vm6, %v2159_v29 }
  0x4b   : > { %2335 = vmatpush3.msra.mxu1 %v612_v26  ;;  %2336 = vmatprep.mubr.msk.f32.mxu1 %vm1004_vm6, %v2166_v30 }
  0x4c   : > { %2325 = vmatprep.mubr.msk.f32.mxu0 %vm1004_vm6, %v2160_v31  ;;  %2374 = vmatprep.subr.mxu1 %v2593_v1 }
  0x4e   : > { %2337 = vmatmul.mubr.msk.f32.vlgmr.msra.gmra.mxu1 %vm1004_vm6, %v2166_v30  ;;  %2326 = vmatmul.mubr.msk.f32.gmra.mxu0 %vm1004_vm6, %v2161_v32 }
  0x4f   : > { %2339 = vmatprep.mubr.msk.f32.mxu1 %vm1004_vm6, %v2166_v30  ;;  %2328 = vmatprep.mubr.msk.f32.mxu0 %vm1004_vm6, %v2162_v33 }
  0x52   : > { %2340 = vmatmul.mubr.msk.f32.gmra.mxu1 %vm1004_vm6, %v2166_v30  ;;  %2329 = vmatmul.mubr.msk.f32.gmra.mxu0 %vm1004_vm6, %v2163_v34 }
  0x53   : > { %2342 = vmatprep.mubr.msk.f32.mxu1 %vm1004_vm6, %v2166_v30  ;;  %2331 = vmatprep.mubr.msk.f32.mxu0 %vm1004_vm6, %v2164_v35 }
  0x56   : > { %2343 = vmatmul.mubr.msk.f32.gmra.mxu1 %vm1004_vm6, %v2166_v30  ;;  %2332 = vmatmul.mubr.msk.f32.gmra.mxu0 %vm1004_vm6, %v2165_v36 }
  0x57   : > { %2345 = vmatprep.mubr.msk.f32.mxu1 %vm1004_vm6, %v2166_v30 }
  0x5a   : > { %2346 = vmatmul.mubr.msk.f32.gmra.mxu1 %vm1004_vm6, %v2166_v30  ;;  %vm1634_vm6 = vcmask 1041409  }
  0x5b   : > { %2382 = vmatprep.mubr.msk.f32.mxu1 %vm2594_vm1, %v2593_v1 }
  0xfa   : > { %v718_v37 = vpop.f32.mrf.mxu1  ;;  %v708_v38 = vpop.f32.mrf.mxu0 }
  0xfc   : > { %v2290_v39 = vpop.f32.mrf.mxu1  ;;  %v2284_v40 = vpop.f32.mrf.mxu0 }
  0xfe   : > { %v792_v41 = vpop.f32.mrf.mxu1  ;;  %v713_v42 = vpop.f32.mrf.mxu0 }
  0xff   : > { %v806_v43 = vmul.f32 %v792_v41, %v708_v38 }
 0x100   : > { %v2295_v44 = vpop.f32.mrf.mxu1  ;;  %v2287_v45 = vpop.f32.mrf.mxu0 }
 0x101   : > { %v1368_v45 = vld [vmem:[%s3085_s10 + $0x30] sm:$0x3] }
 0x102   : > { %v797_v46 = vpop.f32.mrf.mxu1  ;;  %2348 = vmatprep.subr.msk.mxu0 %vm1401_vm3, %v1368_v45 }
 0x103   : > { %v807_v47 = vmul.f32 %v797_v46, %v713_v42  ;;  %2349 = vmatpush3.msk.msra.mxu0 %vm1401_vm3, %v1368_v45  ;;  %v1367_v46 = vld [vmem:[%s3085_s10 + $0x28] sm:$0xff] }
 0x104   : > { %v2298_v48 = vpop.f32.mrf.mxu1  ;;  %2350 = vmatprep.subr.mxu0 %v1367_v46 }
 0x105   : > { %v808_v49 = vadd.f32 %v807_v47, %v806_v43  ;;  %2351 = vmatpush3.msra.mxu0 %v1367_v46  ;;  %v1366_v47 = vld [vmem:[%s3085_s10 + $0x20] sm:$0xff]  ;;  %v1365_v48 = vld [vmem:[%s3085_s10 + $0x18] sm:$0xff] }
 0x106   : > { %v802_v50 = vpop.f32.mrf.mxu1  ;;  %v887_v51 = vpop.f32.mrf.mxu0  ;;  %2352 = vmatprep.subr.mxu0 %v1366_v47 }
 0x107   : > { %v809_v52 = vmul.f32 %v802_v50, %v718_v37  ;;  %2353 = vmatpush3.msra.mxu0 %v1366_v47  ;;  %v1363_v50 = vld [vmem:[%s3085_s10 + $0x8] sm:$0xff] }
 0x108   : > { %v2301_v53 = vpop.f32.mrf.mxu1  ;;  %v2312_v54 = vpop.f32.mrf.mxu0  ;;  %2354 = vmatprep.subr.mxu0 %v1365_v48 }
 0x109   : > { %v810_v55 = vadd.f32 %v809_v52, %v808_v49  ;;  %2355 = vmatpush3.msra.mxu0 %v1365_v48  ;;  %v1364_v49 = vld [vmem:[%s3085_s10 + $0x10] sm:$0xff] }
 0x10a   : > { %v961_v56 = vpop.f32.mrf.mxu1  ;;  %v2324_v58 = vpop.f32.mrf.mxu0  ;;  %2356 = vmatprep.subr.mxu0 %v1364_v49 }
 0x10b   : > { %v962_v59 = vadd.f32 %v961_v56, %v887_v51  ;;  %2357 = vmatpush3.msra.mxu0 %v1364_v49  ;;  %v1362_v51 = vld [vmem:[%s3085_s10] sm:$0xff] }
 0x10c   : > { %v2319_v60 = vpop.f32.mrf.mxu1  ;;  %v1095_v61 = vpop.f32.mrf.mxu0  ;;  %2358 = vmatprep.subr.mxu0 %v1363_v50 }
 0x10d   : > { %v972_v62 = vadd.f32 %v2157_v57, %v962_v59  ;;  %2359 = vmatpush3.msra.mxu0 %v1363_v50 }
 0x10e   : > { %v2338_v63 = vpop.f32.mrf.mxu1  ;;  %v2327_v0 = vpop.f32.mrf.mxu0  ;;  %2360 = vmatprep.subr.mxu0 %v1362_v51 }
 0x10f   : > { %v2892_v5 = vadd.f32 %v972_v62, %v810_v55  ;;  %v1243_v8 = vsub.f32 %v2324_v58, %v2338_v63  ;;  %2361 = vmatpush3.msra.mxu0 %v1362_v51 }
 0x110   : > { %v1203_v6 = vpop.f32.mrf.mxu1  ;;  %v1105_v7 = vpop.f32.mrf.mxu0  ;;  %2403 = vmatprep.subr.mxu0 %v2593_v1 }
 0x111   : > { %v1242_v9 = vsub.f32 %v1095_v61, %v1203_v6  ;;  %v1251_v16 = vmul.f32 %v1243_v8, %v1243_v8  ;;  %v1307_v8 = vld [vmem:[%s3090_s15] sm:$0x1] }
 0x112   : > { %v2341_v10 = vpop.f32.mrf.mxu1  ;;  %v2330_v11 = vpop.f32.mrf.mxu0 }
 0x113   : > { %v1250_v12 = vmul.f32 %v1242_v9, %v1242_v9  ;;  %v1245_v13 = vsub.f32 %v2327_v0, %v2341_v10  ;;  %v1262_v29 = vsel %vm1258_vm15, %v1251_v16, 0.0 }
 0x114   : > { %v1213_v14 = vpop.f32.mrf.mxu1  ;;  %v1115_v15 = vpop.f32.mrf.mxu0 }
 0x115   : > { %v1244_v17 = vsub.f32 %v1105_v7, %v1213_v14  ;;  %v1259_v18 = vsel %vm1258_vm15, %v1250_v12, 0.0  ;;  %v1253_v22 = vmul.f32 %v1245_v13, %v1245_v13  ;;  %v1308_v13 = vsub.f32 0.0, %v1307_v8 }
 0x116   : > { %1260 = vadd.xlane.f32.xlu0 %v1259_v18  ;;  %v2344_v19 = vpop.f32.mrf.mxu1  ;;  %v2333_v20 = vpop.f32.mrf.mxu0  ;;  %v1335_v14 = vsub.s32 0, %v2824_v23 }
 0x117   : > { %v1252_v21 = vmul.f32 %v1244_v17, %v1244_v17  ;;  %v1247_v26 = vsub.f32 %v2330_v11, %v2344_v19  ;;  %v1268_v35 = vsel %vm1258_vm15, %v1253_v22, 0.0  ;;  %v2183_v17 = vld [vmem:[%s3089_s14] ss:$0 sm:$0xff] }
 0x118   : > { %v1223_v24 = vpop.f32.mrf.mxu1  ;;  %v1125_v32 = vpop.f32.mrf.mxu0 }
 0x119   : > { %v1246_v27 = vsub.f32 %v1115_v15, %v1223_v24  ;;  %v1265_v30 = vsel %vm1258_vm15, %v1252_v21, 0.0  ;;  %v1255_v36 = vmul.f32 %v1247_v26, %v1247_v26  ;;  %v1336_v21 = vrot.slane %v1308_v13, %v1335_v14  ;;  %v1625_v13 = vld [vmem:[%s3087_s12 + $0x18] sm:$0xff]  ;;  %v1624_v14 = vld [vmem:[%s3087_s12 + $0x10] sm:$0xff] }
 0x11a   : > { %1263 = vadd.xlane.f32.xlu0 %v1262_v29  ;;  %1266 = vadd.xlane.f32.xlu1 %v1265_v30  ;;  %v2347_v31 = vpop.f32.mrf.mxu1 }
 0x11b   : > { %v1254_v33 = vmul.f32 %v1246_v27, %v1246_v27  ;;  %v1249_v37 = vsub.f32 %v2333_v20, %v2347_v31  ;;  %v1274_v42 = vsel %vm1258_vm15, %v1255_v36, 0.0  ;;  %2375 = vmatpush3.msra.mxu1 %v1625_v13 }
 0x11c   : > { %v1233_v34 = vpop.f32.mrf.mxu1  ;;  %2376 = vmatprep.subr.mxu1 %v2593_v1 }
 0x11d   : > { %v1248_v38 = vsub.f32 %v1125_v32, %v1233_v34  ;;  %v1271_v39 = vsel %vm1258_vm15, %v1254_v33, 0.0  ;;  %v1257_v41 = vmul.f32 %v1249_v37, %v1249_v37  ;;  %2377 = vmatpush3.msra.mxu1 %v1624_v14 }
 0x11e   : > { %1269 = vadd.xlane.f32.xlu1 %v1268_v35  ;;  %1272 = vadd.xlane.f32.xlu0 %v1271_v39 }
 0x11f   : > { %v1256_v40 = vmul.f32 %v1248_v38, %v1248_v38  ;;  %v1280_v44 = vsel %vm1258_vm15, %v1257_v41, 0.0  ;;  %2378 = vmatprep.subr.mxu1 %v2593_v1 }
 0x121   : > { %v1277_v43 = vsel %vm1258_vm15, %v1256_v40, 0.0 }
 0x122   : > { %1275 = vadd.xlane.f32.xlu1 %v1274_v42  ;;  %1278 = vadd.xlane.f32.xlu0 %v1277_v43 }
 0x126   : > { %1281 = vadd.xlane.f32.xlu1 %v1280_v44 }
 0x19f   : > { %v1261_v52 = vpop.xlane.xlu0 %1260 }
 0x1a0   : > { %v1283_v53 = vsub.f32 1e-12, %v1261_v52 }
 0x1a2   : > { %v1291_v54 = vmul.f32 1.442695, %v1283_v53 }
 0x1a3   : > { %v1264_v55 = vpop.xlane.xlu0 %1263  ;;  %v1267_v56 = vpop.xlane.xlu1 %1266 }
 0x1a4   : > { %2462 = vpow2.f32 %v1291_v54  ;;  %v1284_v57 = vsub.f32 1e-12, %v1264_v55  ;;  %v1285_v58 = vsub.f32 1e-12, %v1267_v56 }
 0x1a6   : > { %v1293_v59 = vmul.f32 1.442695, %v1284_v57  ;;  %v1295_v60 = vmul.f32 1.442695, %v1285_v58 }
 0x1a7   : > { %v1270_v61 = vpop.xlane.xlu1 %1269  ;;  %v1273_v62 = vpop.xlane.xlu0 %1272 }
 0x1a8   : > { %2464 = vpow2.f32 %v1293_v59  ;;  %v1286_v63 = vsub.f32 1e-12, %v1270_v61  ;;  %v1287_v0 = vsub.f32 1e-12, %v1273_v62 }
 0x1a9   : > { %2466 = vpow2.f32 %v1295_v60 }
 0x1aa   : > { %v1297_v6 = vmul.f32 1.442695, %v1286_v63  ;;  %v1299_v7 = vmul.f32 1.442695, %v1287_v0 }
 0x1ab   : > { %v1276_v9 = vpop.xlane.xlu1 %1275  ;;  %v1279_v10 = vpop.xlane.xlu0 %1278 }
 0x1ac   : > { %2468 = vpow2.f32 %v1297_v6  ;;  %v1288_v11 = vsub.f32 1e-12, %v1276_v9  ;;  %v1289_v12 = vsub.f32 1e-12, %v1279_v10 }
 0x1ad   : > { %2470 = vpow2.f32 %v1299_v7 }
 0x1ae   : > { %v1301_v15 = vmul.f32 1.442695, %v1288_v11  ;;  %v1303_v16 = vmul.f32 1.442695, %v1289_v12 }
 0x1af   : > { %v1282_v18 = vpop.xlane.xlu1 %1281 }
 0x1b0   : > { %2472 = vpow2.f32 %v1301_v15  ;;  %v1290_v19 = vsub.f32 1e-12, %v1282_v18  ;;  %v1623_v15 = vld [vmem:[%s3087_s12 + $0x8] sm:$0xff] }
 0x1b1   : > { %v2463_v20 = vpop.eup %2462  ;;  %2474 = vpow2.f32 %v1303_v16  ;;  %2379 = vmatpush3.msra.mxu1 %v1623_v15  ;;  %v1622_v16 = vld [vmem:[%s3087_s12] sm:$0xff] }
 0x1b2   : > { %v1316_v22 = vsub.f32 %v2463_v20, %v2183_v17  ;;  %v1305_v24 = vmul.f32 1.442695, %v1290_v19  ;;  %2380 = vmatprep.subr.mxu1 %v2593_v1 }
 0x1b3   : > { %2381 = vmatpush3.msra.mxu1 %v1622_v16 }
 0x1b4   : > { %v1324_v26 = vmul.f32 %v1316_v22, %v1316_v22  ;;  %2476 = vpow2.f32 %v1305_v24  ;;  %2385 = vmatprep.subr.mxu1 %v2593_v1 }
 0x1b5   : > { %v2465_v27 = vpop.eup %2464 }
 0x1b6   : > { %v2467_v29 = vpop.eup %2466  ;;  %v1338_v30 = vmul.f32 %v1336_v21, %v1324_v26  ;;  %v1317_v23 = vsub.f32 %v2465_v27, %v2183_v17 }
 0x1b7   : > { %v1318_v31 = vsub.f32 %v2467_v29, %v2183_v17 }
 0x1b8   : > { %v1346_v32 = vmul.f32 1.442695, %v1338_v30  ;;  %v1325_v33 = vmul.f32 %v1317_v23, %v1317_v23 }
 0x1b9   : > { %v2469_v34 = vpop.eup %2468  ;;  %v1326_v35 = vmul.f32 %v1318_v31, %v1318_v31 }
 0x1ba   : > { %v2471_v36 = vpop.eup %2470  ;;  %2478 = vpow2.f32 %v1346_v32  ;;  %v1339_v37 = vmul.f32 %v1336_v21, %v1325_v33  ;;  %v1319_v38 = vsub.f32 %v2469_v34, %v2183_v17 }
 0x1bb   : > { %v1340_v39 = vmul.f32 %v1336_v21, %v1326_v35  ;;  %v1320_v40 = vsub.f32 %v2471_v36, %v2183_v17 }
 0x1bc   : > { %v1348_v41 = vmul.f32 1.442695, %v1339_v37  ;;  %v1327_v42 = vmul.f32 %v1319_v38, %v1319_v38 }
 0x1bd   : > { %v2473_v43 = vpop.eup %2472  ;;  %v1350_v44 = vmul.f32 1.442695, %v1340_v39  ;;  %v1328_v45 = vmul.f32 %v1320_v40, %v1320_v40 }
 0x1be   : > { %v2475_v46 = vpop.eup %2474  ;;  %2480 = vpow2.f32 %v1348_v41  ;;  %v1341_v47 = vmul.f32 %v1336_v21, %v1327_v42  ;;  %v1321_v48 = vsub.f32 %v2473_v43, %v2183_v17 }
 0x1bf   : > { %2482 = vpow2.f32 %v1350_v44  ;;  %v1342_v49 = vmul.f32 %v1336_v21, %v1328_v45  ;;  %v1322_v50 = vsub.f32 %v2475_v46, %v2183_v17 }
 0x1c0   : > { %v1352_v51 = vmul.f32 1.442695, %v1341_v47  ;;  %v1329_v52 = vmul.f32 %v1321_v48, %v1321_v48 }
 0x1c1   : > { %v2477_v53 = vpop.eup %2476  ;;  %v1354_v54 = vmul.f32 1.442695, %v1342_v49  ;;  %v1330_v55 = vmul.f32 %v1322_v50, %v1322_v50 }
 0x1c2   : > { %2484 = vpow2.f32 %v1352_v51  ;;  %v1343_v56 = vmul.f32 %v1336_v21, %v1329_v52  ;;  %v1323_v57 = vsub.f32 %v2477_v53, %v2183_v17  ;;  %v2184_v17 = vld [vmem:[%s3086_s11] ss:$0 sm:$0xff] }
 0x1c3   : > { %2486 = vpow2.f32 %v1354_v54  ;;  %v1344_v58 = vmul.f32 %v1336_v21, %v1330_v55 }
 0x1c4   : > { %v1356_v59 = vmul.f32 1.442695, %v1343_v56  ;;  %v1331_v60 = vmul.f32 %v1323_v57, %v1323_v57 }
 0x1c5   : > { %v1358_v61 = vmul.f32 1.442695, %v1344_v58 }
 0x1c6   : > { %2488 = vpow2.f32 %v1356_v59  ;;  %v1345_v62 = vmul.f32 %v1336_v21, %v1331_v60 }
 0x1c7   : > { %v2479_v63 = vpop.eup %2478  ;;  %2490 = vpow2.f32 %v1358_v61 }
 0x1c8   : > { %v1360_v0 = vmul.f32 1.442695, %v1345_v62  ;;  %2362 = vmatprep.mubr.msk.f32.mxu0 %vm1376_vm5, %v2479_v63 }
 0x1ca   : > { %2492 = vpow2.f32 %v1360_v0 }
 0x1cb   : > { %v2481_v6 = vpop.eup %2480 }
 0x1cc   : > { %v2483_v7 = vpop.eup %2482  ;;  %2363 = vmatmul.mubr.msk.f32.vlgmr.msra.gmra.mxu0 %vm1376_vm5, %v2481_v6 }
 0x1cd   : > { %2365 = vmatprep.mubr.msk.f32.mxu0 %vm1376_vm5, %v2483_v7 }
 0x1cf   : > { %v2485_v8 = vpop.eup %2484 }
 0x1d0   : > { %v2487_v9 = vpop.eup %2486  ;;  %2366 = vmatmul.mubr.msk.f32.gmra.mxu0 %vm1376_vm5, %v2485_v8 }
 0x1d1   : > { %2368 = vmatprep.mubr.msk.f32.mxu0 %vm1376_vm5, %v2487_v9 }
 0x1d3   : > { %v2489_v10 = vpop.eup %2488 }
 0x1d4   : > { %v2491_v11 = vpop.eup %2490  ;;  %2369 = vmatmul.mubr.msk.f32.gmra.mxu0 %vm1376_vm5, %v2489_v10 }
 0x1d5   : > { %2371 = vmatprep.mubr.msk.f32.mxu0 %vm1376_vm5, %v2491_v11 }
 0x1d7   : > { %v2493_v12 = vpop.eup %2492 }
 0x1d8   : > { %2372 = vmatmul.mubr.msk.f32.gmra.mxu0 %vm1376_vm5, %v2493_v12 }
 0x1d9   : > { %2405 = vmatprep.mubr.msk.f32.mxu0 %vm2594_vm1, %v2593_v1 }
 0x28c   : > { %v2364_v18 = vpop.f32.mrf.mxu0 }
 0x28d   : > { %v1477_v19 = vadd.f32 %v2364_v18, %v2184_v17 }
 0x28e   : > { %v1471_v20 = vpop.f32.mrf.mxu0 }
 0x28f   : > { %v2195_v21 = vmul.f32 -1.442695, %v1477_v19  ;;  %v1472_v22 = vadd.f32 %v2184_v17, %v1471_v20 }
 0x290   : > { %v2367_v24 = vpop.f32.mrf.mxu0 }
 0x291   : > { %2494 = vpow2.f32 %v2195_v21  ;;  %v2194_v26 = vmul.f32 -1.442695, %v1472_v22  ;;  %v1487_v27 = vadd.f32 %v2367_v24, %v2184_v17 }
 0x292   : > { %v1481_v29 = vpop.f32.mrf.mxu0 }
 0x293   : > { %2496 = vpow2.f32 %v2194_v26  ;;  %v2197_v30 = vmul.f32 -1.442695, %v1487_v27  ;;  %v1482_v23 = vadd.f32 %v2184_v17, %v1481_v29 }
 0x294   : > { %v2370_v31 = vpop.f32.mrf.mxu0 }
 0x295   : > { %2498 = vpow2.f32 %v2197_v30  ;;  %v2196_v32 = vmul.f32 -1.442695, %v1482_v23  ;;  %v1497_v33 = vadd.f32 %v2370_v31, %v2184_v17 }
 0x296   : > { %v1491_v34 = vpop.f32.mrf.mxu0 }
 0x297   : > { %2500 = vpow2.f32 %v2196_v32  ;;  %v2199_v35 = vmul.f32 -1.442695, %v1497_v33  ;;  %v1492_v36 = vadd.f32 %v2184_v17, %v1491_v34 }
 0x298   : > { %v2373_v37 = vpop.f32.mrf.mxu0 }
 0x299   : > { %2502 = vpow2.f32 %v2199_v35  ;;  %v2198_v38 = vmul.f32 -1.442695, %v1492_v36  ;;  %v2960_v39 = vadd.f32 %v2373_v37, %v2184_v17 }
 0x29a   : > { %v1501_v40 = vpop.f32.mrf.mxu0 }
 0x29b   : > { %2504 = vpow2.f32 %v2198_v38  ;;  %v2201_v41 = vmul.f32 -1.442695, %v2960_v39  ;;  %v2963_v42 = vadd.f32 %v2184_v17, %v1501_v40 }
 0x29d   : > { %2506 = vpow2.f32 %v2201_v41  ;;  %v2200_v43 = vmul.f32 -1.442695, %v2963_v42 }
 0x29e   : > { %v2495_v44 = vpop.eup %2494 }
 0x29f   : > { %v1535_v45 = vadd.f32 1.0, %v2495_v44  ;;  %2508 = vpow2.f32 %v2200_v43 }
 0x2a0   : > { %v2497_v46 = vpop.eup %2496 }
 0x2a1   : > { %2510 = vrcp.f32 %v1535_v45  ;;  %v1534_v47 = vadd.f32 1.0, %v2497_v46 }
 0x2a2   : > { %v2499_v48 = vpop.eup %2498 }
 0x2a3   : > { %2512 = vrcp.f32 %v1534_v47  ;;  %v1537_v49 = vadd.f32 1.0, %v2499_v48 }
 0x2a4   : > { %v2501_v50 = vpop.eup %2500 }
 0x2a5   : > { %2514 = vrcp.f32 %v1537_v49  ;;  %v1536_v51 = vadd.f32 1.0, %v2501_v50 }
 0x2a6   : > { %v2503_v52 = vpop.eup %2502 }
 0x2a7   : > { %2516 = vrcp.f32 %v1536_v51  ;;  %v1539_v53 = vadd.f32 1.0, %v2503_v52 }
 0x2a8   : > { %v2505_v54 = vpop.eup %2504 }
 0x2a9   : > { %2518 = vrcp.f32 %v1539_v53  ;;  %v1538_v55 = vadd.f32 1.0, %v2505_v54 }
 0x2aa   : > { %v2507_v56 = vpop.eup %2506 }
 0x2ab   : > { %2520 = vrcp.f32 %v1538_v55  ;;  %v1541_v57 = vadd.f32 1.0, %v2507_v56 }
 0x2ac   : > { %v2509_v58 = vpop.eup %2508 }
 0x2ad   : > { %2522 = vrcp.f32 %v1541_v57  ;;  %v1540_v59 = vadd.f32 1.0, %v2509_v58 }
 0x2ae   : > { %v2511_v60 = vpop.eup %2510 }
 0x2af   : > { %v1559_v61 = vmul.f32 %v2511_v60, %v1477_v19  ;;  %2524 = vrcp.f32 %v1540_v59 }
 0x2b0   : > { %v2513_v62 = vpop.eup %2512 }
 0x2b1   : > { %v1573_v63 = vsel %vm817_vm4, %v1559_v61, 0.0  ;;  %v1558_v0 = vmul.f32 %v2513_v62, %v1472_v22 }
 0x2b2   : > { %v2515_v6 = vpop.eup %2514  ;;  %v1574_v7 = vrot.slane %v1573_v63, 4 }
 0x2b3   : > { %v1566_v8 = vsel %vm817_vm4, %v1558_v0, 0.0  ;;  %v1561_v9 = vmul.f32 %v2515_v6, %v1487_v27 }
 0x2b4   : > { %v2517_v10 = vpop.eup %2516  ;;  %v1575_v11 = vadd.f32 %v1574_v7, %v1573_v63  ;;  %v1567_v12 = vrot.slane %v1566_v8, 4 }
 0x2b5   : > { %v1587_v13 = vsel %vm817_vm4, %v1561_v9, 0.0  ;;  %v1560_v14 = vmul.f32 %v2517_v10, %v1482_v23 }
 0x2b6   : > { %v2519_v15 = vpop.eup %2518  ;;  %v1576_v16 = vrot.slane %v1575_v11, 2  ;;  %v1568_v17 = vadd.f32 %v1567_v12, %v1566_v8  ;;  %v1588_v18 = vrot.slane %v1587_v13, 4 }
 0x2b7   : > { %v1580_v19 = vsel %vm817_vm4, %v1560_v14, 0.0  ;;  %v1563_v20 = vmul.f32 %v2519_v15, %v1497_v33 }
 0x2b8   : > { %v2521_v21 = vpop.eup %2520  ;;  %v1577_v22 = vadd.f32 %v1576_v16, %v1575_v11  ;;  %v1569_v24 = vrot.slane %v1568_v17, 2  ;;  %v1589_v26 = vadd.f32 %v1588_v18, %v1587_v13  ;;  %v1581_v29 = vrot.slane %v1580_v19, 4 }
 0x2b9   : > { %v1601_v27 = vsel %vm817_vm4, %v1563_v20, 0.0  ;;  %v1562_v30 = vmul.f32 %v2521_v21, %v1492_v36 }
 0x2ba   : > { %v2523_v31 = vpop.eup %2522  ;;  %v1570_v32 = vadd.f32 %v1569_v24, %v1568_v17  ;;  %v1590_v34 = vrot.slane %v1589_v26, 2  ;;  %v1582_v35 = vadd.f32 %v1581_v29, %v1580_v19  ;;  %v1602_v23 = vrot.slane %v1601_v27, 4  ;;  %v1736_v29 = vld [vmem:[%s3084_s9 + $0x18] sm:$0xff] }
 0x2bb   : > { %v1594_v37 = vsel %vm817_vm4, %v1562_v30, 0.0  ;;  %v1565_v38 = vmul.f32 %v2523_v31, %v2960_v39  ;;  %v1578_v41 = vrot.slane %v1577_v22, 1  ;;  %v1734_v30 = vld [vmem:[%s3084_s9 + $0x8] sm:$0xff]  ;;  %v1733_v31 = vld [vmem:[%s3084_s9] sm:$0xff] }
 0x2bc   : > { %v2525_v40 = vpop.eup %2524  ;;  %v1571_v33 = vrot.slane %v1570_v32, 1  ;;  %v1583_v43 = vrot.slane %v1582_v35, 2  ;;  %v1603_v44 = vadd.f32 %v1602_v23, %v1601_v27  ;;  %v1595_v45 = vrot.slane %v1594_v37, 4  ;;  %v1735_v27 = vld [vmem:[%s3084_s9 + $0x10] sm:$0xff] }
 0x2bd   : > { %v1615_v46 = vsel %vm817_vm4, %v1565_v38, 0.0  ;;  %v1564_v47 = vmul.f32 %v2525_v40, %v2963_v42  ;;  %v1591_v36 = vadd.f32 %v1590_v34, %v1589_v26  ;;  %v1579_v55 = vadd.f32 %v1578_v41, %v1577_v22  ;;  %v1738_v22 = vld [vmem:[%s3084_s9 + $0x28] sm:$0xff]  ;;  %v1737_v26 = vld [vmem:[%s3084_s9 + $0x20] sm:$0xff] }
 0x2be   : > { %v1584_v48 = vadd.f32 %v1583_v43, %v1582_v35  ;;  %v1616_v49 = vrot.slane %v1615_v46, 4  ;;  %v1604_v50 = vrot.slane %v1603_v44, 2  ;;  %v1596_v51 = vadd.f32 %v1595_v45, %v1594_v37 }
 0x2bf   : > { %v1608_v52 = vsel %vm817_vm4, %v1564_v47, 0.0  ;;  %v1572_v53 = vadd.f32 %v1571_v33, %v1570_v32  ;;  %v1592_v58 = vrot.slane %v1591_v36, 1  ;;  %v2203_v32 = vld [vmem:[%s3088_s13] ss:$0 sm:$0xff] }
 0x2c0   : > { %v1585_v39 = vrot.slane %v1584_v48, 1  ;;  %v1617_v54 = vadd.f32 %v1616_v49, %v1615_v46  ;;  %v1597_v56 = vrot.slane %v1596_v51, 2  ;;  %v1609_v57 = vrot.slane %v1608_v52, 4  ;;  %v2528_v47 = vld [vmem:[%s2759_s21] sm:$0xff] }
 0x2c1   : > { %v1605_v60 = vadd.f32 %v1604_v50, %v1603_v44  ;;  %v1635_v63 = vsel %vm1634_vm6, %v1579_v55, %v1572_v53  ;;  %v1593_v9 = vadd.f32 %v1592_v58, %v1591_v36 }
 0x2c2   : > { %v1586_v59 = vadd.f32 %v1585_v39, %v1584_v48  ;;  %v1618_v61 = vrot.slane %v1617_v54, 2  ;;  %v1598_v42 = vadd.f32 %v1597_v56, %v1596_v51  ;;  %v1610_v62 = vadd.f32 %v1609_v57, %v1608_v52 }
 0x2c3   : > { %v1606_v10 = vrot.slane %v1605_v60, 1 }
 0x2c4   : > { %v1619_v0 = vadd.f32 %v1618_v61, %v1617_v54  ;;  %v1637_v6 = vsel %vm1636_vm7, %v1586_v59, %v1635_v63  ;;  %v1599_v7 = vrot.slane %v1598_v42, 1  ;;  %v1611_v8 = vrot.slane %v1610_v62, 2 }
 0x2c5   : > { %v1639_v13 = vsel %vm1638_vm8, %v1593_v9, %v1637_v6  ;;  %v1607_v17 = vadd.f32 %v1606_v10, %v1605_v60 }
 0x2c6   : > { %v1600_v11 = vadd.f32 %v1599_v7, %v1598_v42  ;;  %v1612_v12 = vadd.f32 %v1611_v8, %v1610_v62  ;;  %v1620_v14 = vrot.slane %v1619_v0, 1 }
 0x2c8   : > { %v1641_v15 = vsel %vm1640_vm10, %v1600_v11, %v1639_v13  ;;  %v1613_v16 = vrot.slane %v1612_v12, 1  ;;  %v1621_v19 = vadd.f32 %v1620_v14, %v1619_v0 }
 0x2c9   : > { %v1643_v20 = vsel %vm1642_vm11, %v1607_v17, %v1641_v15 }
 0x2ca   : > { %v1614_v18 = vadd.f32 %v1613_v16, %v1612_v12 }
 0x2cc   : > { %v1645_v21 = vsel %vm1644_vm12, %v1614_v18, %v1643_v20 }
 0x2cd   : > { %v1647_v24 = vsel %vm1646_vm13, %v1621_v19, %v1645_v21 }
 0x2ce   : > { %2383 = vmatmul.mubr.msk.f32.vlgmr.msra.gmra.mxu1 %vm817_vm4, %v1647_v24 }
 0x2cf   : > { %2386 = vmatpush3.msra.mxu1 %v1738_v22  ;;  %2393 = vmatprep.mubr.msk.f32.mxu1 %vm2594_vm1, %v2593_v1 }
 0x2d0   : > { %2387 = vmatprep.subr.mxu1 %v2593_v1 }
 0x2d1   : > { %2388 = vmatpush3.msra.mxu1 %v1737_v26 }
 0x2d2   : > { %2389 = vmatprep.subr.mxu1 %v2593_v1 }
 0x2d3   : > { %2390 = vmatpush3.msra.mxu1 %v1736_v29 }
 0x2d4   : > { %2391 = vmatprep.subr.mxu1 %v2593_v1 }
 0x2d5   : > { %2392 = vmatpush3.msra.mxu1 %v1735_v27 }
 0x2d6   : > { %2394 = vmatmul.mubr.msk.f32.vlgmr.msra.gmra.mxu1 %vm817_vm4, %v2834_v25  ;;  %2396 = vmatprep.subr.mxu1 %v2593_v1  ;;  %v1879_v25 = vld [vmem:[%s3083_s8] sm:$0x1f] }
 0x2d7   : > { %2397 = vmatpush3.msra.mxu1 %v1734_v30  ;;  %2400 = vmatprep.mubr.msk.f32.mxu1 %vm2594_vm1, %v2593_v1 }
 0x2d8   : > { %2398 = vmatprep.subr.mxu1 %v2593_v1  ;;  %2404 = vmatpush3.msk.msra.mxu0 %vm638_vm0, %v1879_v25 }
 0x2d9   : > { %2399 = vmatpush3.msra.mxu1 %v1733_v31  ;;  %2406 = vmatmul.mubr.msk.f32.vlgmr.msra.gmra.mxu0 %vm628_vm2, %v2762_v2 }
 0x2da   : > { %2401 = vmatmul.mubr.msk.f32.vlgmr.msra.gmra.mxu1 %vm891_vm9, %v2853_v28  ;;  %2408 = vmatprep.mubr.msk.f32.mxu0 %vm2594_vm1, %v2593_v1 }
 0x2dd   : > { %2409 = vmatmul.mubr.msk.f32.gmra.mxu0 %vm628_vm2, %v2765_v3 }
 0x2de   : > { %2411 = vmatprep.mubr.msk.f32.mxu0 %vm2594_vm1, %v2593_v1 }
 0x2e1   : > { %2412 = vmatmul.mubr.msk.f32.gmra.mxu0 %vm628_vm2, %v2768_v4 }
 0x38e   : > { %v1716_v28 = vpop.f32.mrf.mxu1 }
 0x38f   : > { %v1720_v34 = vmul.f32 0.125, %v1716_v28 }
 0x390   : > { %v2384_v35 = vpop.f32.mrf.mxu1 }
 0x391   : > { %v1728_v2 = vadd.f32 %v2203_v32, %v1720_v34 }
 0x393   : > { %v1730_v23 = vadd.f32 %v2892_v5, %v1728_v2 }
 0x395   : > { %2526 = vtanh.f32 %v1730_v23 }
 0x396   : > { %v1805_v37 = vpop.f32.mrf.mxu1 }
 0x398   : > { %v2395_v38 = vpop.f32.mrf.mxu1 }
 0x399   : > { %v1977_v41 = vpop.f32.mrf.mxu0 }
 0x39a   : > { %v1875_v3 = vpop.f32.mrf.mxu1 }
 0x39b   : > { %v1876_v1 = vadd.f32 %v1875_v3, %v1805_v37  ;;  %v2407_v33 = vpop.f32.mrf.mxu0 }
 0x39c   : > { %v2402_v40 = vpop.f32.mrf.mxu1 }
 0x39d   : > { %1881 = vrot.lane.b32.xlu0 %v1876_v1, %s2595_s18  ;;  %v1982_v5 = vpop.f32.mrf.mxu0  ;;  %s2596_s18 = smov [#allocation2]  }
 0x39e   : > { %s2535_s4 = sshll.u32 %s2596_s18, 4  ;;  %s2536_s4 = int_to_ptr.vmem [resolvable:$false] %s2535_s4 }
 0x39f   : > { %v2410_v43 = vpop.f32.mrf.mxu0  ;;  %s2537_s28 = scalar_lea.vmem %s2536_s4, 256  ;;  %p2538_p0 = scmp.lt.s32.totalorder %s2015_s26, %s2536_s4 }
 0x3a0   : > { %p2539_p1 = scmp.lt.s32.totalorder %s2537_s28, %s2531_s20 }
 0x3a1   : > { %v1987_v44 = vpop.f32.mrf.mxu0 }
 0x3a2   : > { %v2527_v4 = vpop.eup %2526  ;;  %p2540_p2 = por %p2539_p1, %p2538_p0 }
 0x3a3   : > { %1732 = vst.msk [vmem:[%s581_s5] sm:$0xff] %vm817_vm4, %v2527_v4  ;;  %v2413_v45 = vpop.f32.mrf.mxu0 }
 0x3a4   : > { %p2541_p3 = pnand %p2540_p2, %p2534_p13 }
 0x40f   : > { %v1882_v46 = vpop.permute.xlu0 %1881 }
 0x410   : > { %v1884_v36 = vmul.f32 %v2528_v47, %v1882_v46 }
 0x411   : > { %2544 = shalt.err (!%p2541_p3)
}
 0x412   : > { %s2545_s5 = scalar_lea.hbm %s3032_s2, 128  ;;  %s2549_s19 = scalar_lea.hbm %s3091_s16, 256 }
 0x413   : > { %p2546_p4 = scmp.ne.s32.totalorder %s3032_s2, %s2545_s5  ;;  %p2550_p9 = scmp.lt.s32.totalorder %s3032_s2, %s3091_s16 }
 0x414   : > { %p2551_p10 = scmp.lt.s32.totalorder %s2549_s19, %s2545_s5 }
 0x415   : > { %p2547_p7 = pnand %p2546_p4, %p2726_p5 }
 0x416   : > { %p2552_p11 = por %p2551_p10, %p2550_p9 }
 0x417   : > { %p2548_p8 = pneg %p2547_p7 }
 0x419   : > { %p2553_p12 = pnand %p2552_p11, %p2548_p8 }
 0x41b   : > { %2556 = shalt.err (!%p2553_p12)
}
 0x41c   : > { %2417 = dma.vmem_to_hbm [thread:$0]  (%p2726_p5), %s2015_s26, 128, %s3032_s2, %s1996_s0   ;;  %v2529_v48 = vld [vmem:[%s2759_s21 + $0x8] sm:$0xff]  ;;  %v2530_v50 = vld [vmem:[%s2759_s21 + $0x10] sm:$0xff]  ;;  %vm1991_vm0 = vcmask 31744  }
 0x41d   : > { %s2597_s20 = smov 127   ;;  %v1885_v49 = vmul.f32 %v2529_v48, %v1882_v46  ;;  %v1886_v51 = vmul.f32 %v2530_v50, %v1882_v46  ;;  %s3114_s4 = smul.u32 24, %s2745_s23 }
 0x41e   : > { %1890 = vrot.lane.b32.xlu1 %v1884_v36, %s2597_s20 }
 0x41f   : > { %s610_s29 = scalar_lea.vmem %s3092_s17, %s3114_s4 }
 0x422   : > { %1892 = vrot.lane.b32.xlu1 %v1885_v49, %s2597_s20 }
 0x426   : > { %1894 = vrot.lane.b32.xlu1 %v1886_v51, %s2597_s20 }
 0x490   : > { %v1891_v52 = vpop.permute.xlu1 %1890 }
 0x491   : > { %v1978_v53 = vadd.f32 %v1977_v41, %v1891_v52 }
 0x493   : > { %1992 = vst.msk [vmem:[%s610_s29] sm:$0xff] %vm1991_vm0, %v1978_v53 }
 0x494   : > { %v1893_v39 = vpop.permute.xlu1 %1892 }
 0x495   : > { %v1983_v54 = vadd.f32 %v1982_v5, %v1893_v39 }
 0x497   : > { %1993 = vst.msk [vmem:[%s610_s29 + $0x8] sm:$0xff] %vm1991_vm0, %v1983_v54 }
 0x498   : > { %v1895_v55 = vpop.permute.xlu1 %1894 }
 0x499   : > { %v1988_v56 = vadd.f32 %v1987_v44, %v1895_v55 }
 0x49b   : > { %1994 = vst.msk [vmem:[%s610_s29 + $0x10] sm:$0xff] %vm1991_vm0, %v1988_v56 }
 0x49c PF: > { %p2423_p5 = scmp.ge.s32.totalorder %s2591_s27, 2  ;;  %s2029_s23 = sand.u32 1, %s2579_s24  }
 0x49d   : > { %s2030_s21 = scalar_lea.sflag [#allocation3], %s2029_s23 }
 0x49e   : > { %p2420_p13 = pnand %p2423_p5, %p2730_p6 }
 0x4a0   : > { %p2421_p0 = pneg %p2420_p13 }
 0x4a2   : > { %2574 = dma.done.wait (%p2421_p0), %s2030_s21, 128  }
 0x4a3   : > { %2576 = vsyncadd (%p2421_p0), %s2030_s21, 4294967168  ;;  %s3116_s27 = sld [smem:[#allocation6_spill]]  ;;  %s3119_s24 = smov %s2583_s25 }
 0x4a4   : > { %s3117_s26 = sld [smem:[#allocation5_spill]] }
 0x4a5   : > { %s3118_s2 = sld [smem:[#allocation7_spill]] }
 0x4a9   : > { %p28_p1 = scmp.ge.s32.totalorder %s3116_s27, 4  }
 0x4aa   : > { %s3120_s25 = smov %s3117_s26 }
 0x4ab   : > { %s3121_s26 = smov %s3118_s2  ;;  %30 = sbr.rel (!%p28_p1) target bundleno = 9 (0x9), region = 140 }
 0x4b0   :  { %2043 = vsyncpa [#allocation3], 1 }
 0x4b1   :  { %2045 = vsyncpa [#allocation3 + $0x1], 1 }

</bundles_post_ra>
